<compile_context>
chip_gen: v6e
topology: v6e:2x2x1
jax: 0.10.0
libtpu: 0.0.40
codegen_flags: <defaults>
</compile_context>

<pallas_src>
import functools

import jax
import jax.numpy as jnp
from jax import lax
from jax.experimental import pallas as pl
from jax.experimental.pallas import tpu as pltpu
import numpy as np


# ----------------------------------------------------------------------------
# Fused SelfTrans kernel: Q proj + MoS attention + out-proj + BN + residual.
# One (batch, query-tile) grid point per invocation; pooled K/V cached.
# ----------------------------------------------------------------------------
def _self_trans_kernel(x_ref, xp_ref, wq_ref, bq_ref, wkv_ref, bkv_ref,
                       pi_ref, wo_ref, bns_ref, bnb_ref,
                       o_ref, ktT_scr, vt_scr, *,
                       n_head, n_mix, d_k, d_v, n_valid_kv, add_residual):
    f32 = jnp.float32
    bf16 = jnp.bfloat16
    nh_dk = n_head * d_k
    t = pl.program_id(1)

    # ---- once per batch element: fused pooled K/V projections -> scratch ---
    @pl.when(t == 0)
    def _():
        kv = (jnp.dot(wkv_ref[...], xp_ref[0], preferred_element_type=f32)
              + bkv_ref[...])                               # (nh*(dk+dv), N2p)
        ktT_scr[...] = jnp.transpose(kv[:nh_dk, :])         # (N2p, nh*dk)
        vt_scr[...] = kv[nh_dk:, :]                         # (nh*dv, N2p)

    x_tile = x_ref[0]                                       # (C, TQ), x dtype
    # Q projection for this query tile; wq/bq are pre-scaled by 1/sqrt(d_k)
    # in the wrapper, so no per-score temperature multiply is needed.
    qt = (jnp.dot(wq_ref[...], x_tile.astype(bf16),
                  preferred_element_type=f32) + bq_ref[...])        # (nh*dk, TQ)

    ktT = ktT_scr[...]                                      # (N2p, nh*dk) f32
    vt = vt_scr[...]                                        # (nh*dv, N2p) f32
    wo = wo_ref[...]                                        # (C, nh*dv)   f32
    n2p = ktT.shape[0]

    mask_keys = n_valid_kv != n2p
    if mask_keys:
        # Additive (N2p, 1) column: padded key rows -> -1e30 -> exp == 0.
        kmask = jnp.where(
            lax.broadcasted_iota(jnp.int32, (n2p, 1), 0) < n_valid_kv,
            0.0, -1e30).astype(f32)

    if n_mix > 1:
        pi_row = pi_ref[0]                                  # (1, n_head*n_mix)

    d = d_k // n_mix
    y = None
    for h in range(n_head):
        v_h = vt[h * d_v:(h + 1) * d_v, :].astype(bf16)     # (d_v, N2p)
        head_out = None
        for i in range(n_mix):
            off = h * d_k + i * d
            q_i = qt[off:off + d, :].astype(bf16)           # (d, TQ)
            k_i = ktT[:, off:off + d].astype(bf16)          # (N2p, d)
            # Transposed scores: softmax reduces over sublanes and the V /
            # output-projection matmuls below need no further transposes.
            s_t = jnp.dot(k_i, q_i, preferred_element_type=f32)    # (N2p, TQ)
            if mask_keys:
                s_t = s_t + kmask
            m = jnp.max(s_t, axis=0, keepdims=True)                # (1, TQ)
            e = jnp.exp(s_t - m)
            denom = jnp.sum(e, axis=0, keepdims=True)              # (1, TQ)
            scale = 1.0 / denom          # exact; (1, TQ) row so cost is nil
            if n_mix > 1:
                # Mixture gate folded into the softmax normalizer row.
                scale = scale * pi_row[:, h * n_mix + i:h * n_mix + i + 1]
            p = (e * scale).astype(bf16)                           # (N2p, TQ)
            # TODO(synk): attention dropout (p=0.1) omitted -> inference mode.
            pv = jnp.dot(v_h, p, preferred_element_type=f32)       # (d_v, TQ)
            head_out = pv if head_out is None else head_out + pv
        # Output 1x1-conv projection, accumulated per head (retires head_out).
        wo_h = wo[:, h * d_v:(h + 1) * d_v].astype(bf16)           # (C, d_v)
        yc = jnp.dot(wo_h, head_out.astype(bf16),
                     preferred_element_type=f32)                   # (C, TQ)
        y = yc if y is None else y + yc

    # Fused BatchNorm(eval) + residual; output stays lane-dense (C, TQ).
    y = y * bns_ref[...] + bnb_ref[...]
    if add_residual:
        y = y + x_tile.astype(f32)
    o_ref[0] = y.astype(o_ref.dtype)


# ----------------------------------------------------------------------------
# JAX glue: AvgPool2d(3, 2, 1, count_include_pad=False) and the wrapper.
# ----------------------------------------------------------------------------
def avg_pool_3x3_s2_p1(x):
    s = lax.reduce_window(x, 0.0, lax.add, (1, 1, 3, 3), (1, 1, 2, 2),
                          ((0, 0), (0, 0), (1, 1), (1, 1)))
    ones = jnp.ones(x.shape[2:], x.dtype)
    cnt = lax.reduce_window(ones, 0.0, lax.add, (3, 3), (2, 2),
                            ((1, 1), (1, 1)))
    return s / cnt[None, None]


def _round_up(n, m):
    return (n + m - 1) // m * m


def self_trans_forward(x, params, *, n_head, n_mix, d_k, d_v,
                       pooling=True, concat=False, bn_eps=1e-5, q_tile=512):
    f32 = jnp.float32
    bf16 = jnp.bfloat16
    B, C, H, W = x.shape
    N = H * W
    x_flat = x.reshape(B, C, N)

    if pooling:
        # TODO(synk): the 3x3/s2 avg-pool could also be fused into the kernel;
        # kept as one cheap XLA reduce_window on the small pooled tensor.
        xp = avg_pool_3x3_s2_p1(x)
        xp_flat = xp.reshape(B, C, xp.shape[2] * xp.shape[3])
    else:
        xp_flat = x_flat
    N2 = xp_flat.shape[-1]

    nh_dk = n_head * d_k
    nh_dv = n_head * d_v
    inv_temperature = float(d_k) ** -0.5

    # ---- tiny one-off precomputations in XLA (all O(C)/O(head) sized) ------
    # Temperature folded into the Q projection only (K/V keep the raw w_qs).
    wq_q = (params["w_qs"] * inv_temperature).astype(bf16)
    bq_q = (params["b_qs"] * inv_temperature).reshape(nh_dk, 1).astype(f32)
    # K and V projections share the pooled input -> one fused weight matrix.
    w_kv = jnp.concatenate([params["w_qs"], params["w_vs"]], axis=0).astype(bf16)
    b_kv = jnp.concatenate([params["b_qs"], params["b_vs"]],
                           axis=0).reshape(nh_dk + nh_dv, 1).astype(f32)
    # Mixture-of-softmax gate: the mean over queries commutes with the 1x1
    # conv, so pi can be computed exactly here from the (B, C) spatial mean.
    if n_mix > 1:
        bar_x = jnp.mean(x_flat, axis=2)                              # (B, C)
        bar_q = (jnp.einsum("oc,bc->bo", params["w_qs"].astype(bf16),
                            bar_x.astype(bf16), preferred_element_type=f32)
                 + params["b_qs"][None, :])                           # (B, nh*dk)
        logits = jnp.einsum("md,bhd->bhm", params["mix_w"],
                            bar_q.reshape(B, n_head, d_k))
        pi = jax.nn.softmax(logits, axis=-1).reshape(B, 1, n_head * n_mix)
    else:
        pi = jnp.ones((B, 1, n_head), f32)
    bn_scale = params["bn_gamma"] / jnp.sqrt(params["bn_var"] + bn_eps)
    bn_bias = params["bn_beta"] - params["bn_mean"] * bn_scale

    # ---- lane / tile padding ------------------------------------------------
    tq = min(_round_up(q_tile, 128), _round_up(N, 128))
    Np = _round_up(N, tq)
    N2p = _round_up(N2, 128)
    if Np != N:
        x_flat = jnp.pad(x_flat, ((0, 0), (0, 0), (0, Np - N)))
    xp_flat = xp_flat.astype(bf16)        # keys/values are only used in bf16
    if N2p != N2:
        xp_flat = jnp.pad(xp_flat, ((0, 0), (0, 0), (0, N2p - N2)))
    n_q_tiles = Np // tq

    kernel = functools.partial(
        _self_trans_kernel, n_head=n_head, n_mix=n_mix, d_k=d_k, d_v=d_v,
        n_valid_kv=N2, add_residual=not concat)

    y = pl.pallas_call(
        kernel,
        out_shape=jax.ShapeDtypeStruct((B, C, Np), x.dtype),
        grid=(B, n_q_tiles),
        in_specs=[
            pl.BlockSpec((1, C, tq), lambda b, t: (b, 0, t)),
            pl.BlockSpec((1, C, N2p), lambda b, t: (b, 0, 0)),
            pl.BlockSpec((nh_dk, C), lambda b, t: (0, 0)),
            pl.BlockSpec((nh_dk, 1), lambda b, t: (0, 0)),
            pl.BlockSpec((nh_dk + nh_dv, C), lambda b, t: (0, 0)),
            pl.BlockSpec((nh_dk + nh_dv, 1), lambda b, t: (0, 0)),
            pl.BlockSpec((1, 1, pi.shape[-1]), lambda b, t: (b, 0, 0)),
            pl.BlockSpec((C, nh_dv), lambda b, t: (0, 0)),
            pl.BlockSpec((C, 1), lambda b, t: (0, 0)),
            pl.BlockSpec((C, 1), lambda b, t: (0, 0)),
        ],
        out_specs=pl.BlockSpec((1, C, tq), lambda b, t: (b, 0, t)),
        scratch_shapes=[
            pltpu.VMEM((N2p, nh_dk), jnp.float32),   # cached K^T (per batch)
            pltpu.VMEM((nh_dv, N2p), jnp.float32),   # cached V   (per batch)
        ],
        compiler_params=pltpu.CompilerParams(
            dimension_semantics=("parallel", "arbitrary"),
            vmem_limit_bytes=32 * 1024 * 1024),
    )(x_flat, xp_flat, wq_q, bq_q, w_kv, b_kv, pi, params["w_o"],
      bn_scale.reshape(C, 1), bn_bias.reshape(C, 1))

    out = y[:, :, :N].reshape(B, C, H, W)
    if concat:
        return jnp.concatenate([out, x], axis=1)
    return out


# ----------------------------------------------------------------------------
# Pure-JAX reference (PyTorch structure, same bf16-MXU / f32-accum policy).
# ----------------------------------------------------------------------------
def reference_forward(x, params, *, n_head, n_mix, d_k, d_v,
                      pooling=True, concat=False, bn_eps=1e-5):
    bf16 = jnp.bfloat16
    f32 = jnp.float32
    B, C, H, W = x.shape
    N = H * W

    def pconv(xf, w, b=None):
        y = jnp.einsum("oc,bcn->bon", w.astype(bf16), xf.astype(bf16),
                       preferred_element_type=f32)
        if b is not None:
            y = y + b[None, :, None]
        return y

    x_flat = x.reshape(B, C, N)
    if pooling:
        xp = avg_pool_3x3_s2_p1(x)
        xp_flat = xp.reshape(B, C, -1)
    else:
        xp_flat = x_flat
    N2 = xp_flat.shape[-1]

    qt = pconv(x_flat, params["w_qs"], params["b_qs"])
    kt = pconv(xp_flat, params["w_qs"], params["b_qs"])
    vt = pconv(xp_flat, params["w_vs"], params["b_vs"])

    Bh = B * n_head
    qt = qt.reshape(Bh, d_k, N)
    kt = kt.reshape(Bh, d_k, N2)
    vt = vt.reshape(Bh, d_v, N2)

    m = n_mix
    d = d_k // m
    temp = float(d_k) ** 0.5
    q = qt.reshape(Bh * m, d, N).transpose(0, 2, 1)             # (Bh*m, N, d)
    k = kt.reshape(Bh * m, d, N2)                               # (Bh*m, d, N2)
    v = vt.transpose(0, 2, 1)                                   # (Bh, N2, d_v)
    attn = jnp.einsum("bnd,bdk->bnk", q.astype(bf16), k.astype(bf16),
                      preferred_element_type=f32) / temp
    attn = jax.nn.softmax(attn, axis=2)
    if m > 1:
        bar = jnp.mean(qt, axis=2, keepdims=True)               # (Bh, d_k, 1)
        pi = jax.nn.softmax(
            jnp.einsum("md,bdo->bmo", params["mix_w"], bar), axis=1)
        attn = (attn * pi.reshape(Bh * m, 1, 1)).reshape(Bh, m, N, N2).sum(1)
    out = jnp.einsum("bnk,bkd->bnd", attn.astype(bf16), v.astype(bf16),
                     preferred_element_type=f32)                # (Bh, N, d_v)
    out = out.transpose(0, 2, 1).reshape(B, n_head * d_v, N)
    out = jnp.einsum("oc,bcn->bon", params["w_o"].astype(bf16),
                     out.astype(bf16),
                     preferred_element_type=f32).reshape(B, C, H, W)
    scale = params["bn_gamma"] / jnp.sqrt(params["bn_var"] + bn_eps)
    shift = params["bn_beta"] - params["bn_mean"] * scale
    out = out * scale[None, :, None, None] + shift[None, :, None, None]
    if concat:
        return jnp.concatenate([out, x], axis=1)
    return out + x


# ----------------------------------------------------------------------------
# Deterministic parameter init (matches __init__ shapes / init distributions).
# ----------------------------------------------------------------------------
def init_params(key, *, n_head, n_mix, d_model, d_k, d_v):
    ks = jax.random.split(key, 6)
    std_q = np.sqrt(2.0 / (d_model + d_k))
    std_v = np.sqrt(2.0 / (d_model + d_v))
    bbound = 1.0 / np.sqrt(d_model)
    mix_std = np.power(n_mix, -0.5)
    return {
        "w_qs": std_q * jax.random.normal(ks[0], (n_head * d_k, d_model), jnp.float32),
        "b_qs": jax.random.uniform(ks[1], (n_head * d_k,), jnp.float32, -bbound, bbound),
        "w_vs": std_v * jax.random.normal(ks[2], (n_head * d_v, d_model), jnp.float32),
        "b_vs": jax.random.uniform(ks[3], (n_head * d_v,), jnp.float32, -bbound, bbound),
        "mix_w": jax.random.uniform(ks[4], (n_mix, d_k), jnp.float32, -mix_std, mix_std),
        "w_o": (1.0 / np.sqrt(n_head * d_v)) *
               jax.random.normal(ks[5], (d_model, n_head * d_v), jnp.float32),
        # Eval-mode BatchNorm2d(d_model) params (defaults == fresh BN).
        "bn_gamma": jnp.ones((d_model,), jnp.float32),
        "bn_beta": jnp.zeros((d_model,), jnp.float32),
        "bn_mean": jnp.zeros((d_model,), jnp.float32),
        "bn_var": jnp.ones((d_model,), jnp.float32),
    }


if __name__ == "__main__":
    # Small config: n_head=2, n_mix=2, d_model=d_k=d_v=16, H=W=16, B=2.
    n_head, n_mix, d_model, d_k, d_v = 2, 2, 16, 16, 16
    B, H, W = 2, 16, 16

    key = jax.random.PRNGKey(0)
    kx, kp = jax.random.split(key)
    x = jax.random.normal(kx, (B, d_model, H, W), jnp.float32)
    params = init_params(kp, n_head=n_head, n_mix=n_mix,
                         d_model=d_model, d_k=d_k, d_v=d_v)

    # q_tile=128 exercises the multi-tile path (2 query tiles per batch) with
    # the per-batch K/V scratch cache at these small shapes.
    fwd = jax.jit(functools.partial(self_trans_forward, n_head=n_head,
                                    n_mix=n_mix, d_k=d_k, d_v=d_v,
                                    q_tile=128))
    out = fwd(x, params)
    jax.block_until_ready(out)

    ref = reference_forward(x, params, n_head=n_head, n_mix=n_mix,
                            d_k=d_k, d_v=d_v)
    assert out.shape == (B, d_model, H, W)
    max_err = float(jnp.max(jnp.abs(out - ref)))
    assert jnp.allclose(out, ref, rtol=5e-3, atol=5e-3), f"mismatch: {max_err}"
    print("KERNEL_OK")
</pallas_src>

<mosaic_0001>
module attributes {stable_mosaic.version = 11 : i64} {
  func.func @_self_trans_kernel(%arg0: i32, %arg1: i32, %arg2: memref<1x16x128xf32, #tpu.memory_space<vmem>>, %arg3: memref<1x16x128xbf16, #tpu.memory_space<vmem>>, %arg4: memref<32x16xbf16, #tpu.memory_space<vmem>>, %arg5: memref<32x1xf32, #tpu.memory_space<vmem>>, %arg6: memref<64x16xbf16, #tpu.memory_space<vmem>>, %arg7: memref<64x1xf32, #tpu.memory_space<vmem>>, %arg8: memref<1x1x4xf32, #tpu.memory_space<vmem>>, %arg9: memref<16x32xf32, #tpu.memory_space<vmem>>, %arg10: memref<16x1xf32, #tpu.memory_space<vmem>>, %arg11: memref<16x1xf32, #tpu.memory_space<vmem>>, %arg12: memref<1x16x128xf32, #tpu.memory_space<vmem>>, %arg13: memref<128x32xf32, #tpu.memory_space<vmem>>, %arg14: memref<32x128xf32, #tpu.memory_space<vmem>>) attributes {dimension_semantics = [#tpu.dimension_semantics<parallel>, #tpu.dimension_semantics<arbitrary>], iteration_bounds = array<i64: 2, 2>, scalar_prefetch = 0 : i64, scratch_operands = 2 : i64, tpu.core_type = #tpu.core_type<tc>, window_params = [{transform_indices = @transform_0, window_bounds = array<i64: 1, 16, 128>}, {transform_indices = @transform_1, window_bounds = array<i64: 1, 16, 128>}, {pipeline_mode = #tpu.pipeline_mode<synchronous>, transform_indices = @transform_2, window_bounds = array<i64: 32, 16>}, {pipeline_mode = #tpu.pipeline_mode<synchronous>, transform_indices = @transform_3, window_bounds = array<i64: 32, 1>}, {pipeline_mode = #tpu.pipeline_mode<synchronous>, transform_indices = @transform_4, window_bounds = array<i64: 64, 16>}, {pipeline_mode = #tpu.pipeline_mode<synchronous>, transform_indices = @transform_5, window_bounds = array<i64: 64, 1>}, {transform_indices = @transform_6, window_bounds = array<i64: 1, 1, 4>}, {pipeline_mode = #tpu.pipeline_mode<synchronous>, transform_indices = @transform_7, window_bounds = array<i64: 16, 32>}, {pipeline_mode = #tpu.pipeline_mode<synchronous>, transform_indices = @transform_8, window_bounds = array<i64: 16, 1>}, {pipeline_mode = #tpu.pipeline_mode<synchronous>, transform_indices = @transform_9, window_bounds = array<i64: 16, 1>}, {transform_indices = @transform_10, window_bounds = array<i64: 1, 16, 128>}]} {
    %c0_i32 = arith.constant 0 : i32
    %0 = arith.cmpi eq, %arg1, %c0_i32 : i32
    %1 = arith.extui %0 : i1 to i32
    %c0_i32_0 = arith.constant 0 : i32
    %2 = arith.cmpi ne, %1, %c0_i32_0 : i32
    scf.if %2 {
      %c0_47 = arith.constant 0 : index
      %c0_48 = arith.constant 0 : index
      %139 = vector.load %arg6[%c0_47, %c0_48] : memref<64x16xbf16, #tpu.memory_space<vmem>>, vector<64x16xbf16>
      %c0_49 = arith.constant 0 : index
      %c0_50 = arith.constant 0 : index
      %c0_51 = arith.constant 0 : index
      %140 = vector.load %arg3[%c0_49, %c0_50, %c0_51] : memref<1x16x128xbf16, #tpu.memory_space<vmem>>, vector<1x16x128xbf16>
      %141 = vector.shape_cast %140 : vector<1x16x128xbf16> to vector<16x128xbf16>
      %cst_52 = arith.constant dense<0.000000e+00> : vector<64x128xf32>
      %142 = tpu.matmul %139, %141, %cst_52 {dimension_numbers = #tpu.dot_dimension_numbers<[1], [0], [0], [1], [0, 0, 1, 1], [], []>} : vector<64x16xbf16>, vector<16x128xbf16>, vector<64x128xf32> -> vector<64x128xf32>
      %c0_53 = arith.constant 0 : index
      %c0_54 = arith.constant 0 : index
      %143 = vector.load %arg7[%c0_53, %c0_54] : memref<64x1xf32, #tpu.memory_space<vmem>>, vector<64x1xf32>
      %144 = vector.broadcast %143 : vector<64x1xf32> to vector<64x128xf32>
      %145 = arith.addf %142, %144 : vector<64x128xf32>
      %146 = vector.extract_strided_slice %145 {offsets = [0, 0], sizes = [32, 128], strides = [1, 1]} : vector<64x128xf32> to vector<32x128xf32>
      %147 = tpu.transpose %146, [1, 0] : vector<32x128xf32> -> vector<128x32xf32>
      %c0_55 = arith.constant 0 : index
      %c0_56 = arith.constant 0 : index
      %148 = vector.load %arg13[%c0_55, %c0_56] : memref<128x32xf32, #tpu.memory_space<vmem>>, vector<128x32xf32>
      tpu.vector_store %arg13[%c0_55, %c0_56], %147 {strides = array<i32>} : memref<128x32xf32, #tpu.memory_space<vmem>>, vector<128x32xf32>,
      %149 = vector.extract_strided_slice %145 {offsets = [32, 0], sizes = [32, 128], strides = [1, 1]} : vector<64x128xf32> to vector<32x128xf32>
      %c0_57 = arith.constant 0 : index
      %c0_58 = arith.constant 0 : index
      %150 = vector.load %arg14[%c0_57, %c0_58] : memref<32x128xf32, #tpu.memory_space<vmem>>, vector<32x128xf32>
      tpu.vector_store %arg14[%c0_57, %c0_58], %149 {strides = array<i32>} : memref<32x128xf32, #tpu.memory_space<vmem>>, vector<32x128xf32>,
    } else {
    }
    %c0 = arith.constant 0 : index
    %c0_1 = arith.constant 0 : index
    %c0_2 = arith.constant 0 : index
    %3 = vector.load %arg2[%c0, %c0_1, %c0_2] : memref<1x16x128xf32, #tpu.memory_space<vmem>>, vector<1x16x128xf32>
    %4 = vector.shape_cast %3 : vector<1x16x128xf32> to vector<16x128xf32>
    %c0_3 = arith.constant 0 : index
    %c0_4 = arith.constant 0 : index
    %5 = vector.load %arg4[%c0_3, %c0_4] : memref<32x16xbf16, #tpu.memory_space<vmem>>, vector<32x16xbf16>
    %6 = arith.truncf %4 : vector<16x128xf32> to vector<16x128xbf16>
    %cst = arith.constant dense<0.000000e+00> : vector<32x128xf32>
    %7 = tpu.matmul %5, %6, %cst {dimension_numbers = #tpu.dot_dimension_numbers<[1], [0], [0], [1], [0, 0, 1, 1], [], []>} : vector<32x16xbf16>, vector<16x128xbf16>, vector<32x128xf32> -> vector<32x128xf32>
    %c0_5 = arith.constant 0 : index
    %c0_6 = arith.constant 0 : index
    %8 = vector.load %arg5[%c0_5, %c0_6] : memref<32x1xf32, #tpu.memory_space<vmem>>, vector<32x1xf32>
    %9 = vector.broadcast %8 : vector<32x1xf32> to vector<32x128xf32>
    %10 = arith.addf %7, %9 : vector<32x128xf32>
    %c0_7 = arith.constant 0 : index
    %c0_8 = arith.constant 0 : index
    %11 = vector.load %arg13[%c0_7, %c0_8] : memref<128x32xf32, #tpu.memory_space<vmem>>, vector<128x32xf32>
    %c0_9 = arith.constant 0 : index
    %c0_10 = arith.constant 0 : index
    %12 = vector.load %arg14[%c0_9, %c0_10] : memref<32x128xf32, #tpu.memory_space<vmem>>, vector<32x128xf32>
    %c0_11 = arith.constant 0 : index
    %c0_12 = arith.constant 0 : index
    %13 = vector.load %arg9[%c0_11, %c0_12] : memref<16x32xf32, #tpu.memory_space<vmem>>, vector<16x32xf32>
    %14 = tpu.iota {dimensions = array<i32: 0>} : vector<128x1xi32>
    %c64_i32 = arith.constant 64 : i32
    %15 = vector.broadcast %c64_i32 : i32 to vector<128x1xi32>
    %16 = arith.cmpi slt, %14, %15 : vector<128x1xi32>
    %cst_13 = arith.constant 0.000000e+00 : f32
    %cst_14 = arith.constant -1.000000e+30 : f32
    %17 = vector.broadcast %cst_13 : f32 to vector<128x1xf32>
    %18 = vector.broadcast %cst_14 : f32 to vector<128x1xf32>
    %19 = arith.select %16, %17, %18 : vector<128x1xi1>, vector<128x1xf32>
    %c0_15 = arith.constant 0 : index
    %c0_16 = arith.constant 0 : index
    %c0_17 = arith.constant 0 : index
    %20 = vector.load %arg8[%c0_15, %c0_16, %c0_17] : memref<1x1x4xf32, #tpu.memory_space<vmem>>, vector<1x1x4xf32>
    %21 = vector.shape_cast %20 : vector<1x1x4xf32> to vector<1x4xf32>
    %22 = vector.extract_strided_slice %12 {offsets = [0, 0], sizes = [16, 128], strides = [1, 1]} : vector<32x128xf32> to vector<16x128xf32>
    %23 = arith.truncf %22 : vector<16x128xf32> to vector<16x128xbf16>
    %24 = vector.extract_strided_slice %10 {offsets = [0, 0], sizes = [8, 128], strides = [1, 1]} : vector<32x128xf32> to vector<8x128xf32>
    %25 = arith.truncf %24 : vector<8x128xf32> to vector<8x128xbf16>
    %26 = vector.extract_strided_slice %11 {offsets = [0, 0], sizes = [128, 8], strides = [1, 1]} : vector<128x32xf32> to vector<128x8xf32>
    %27 = arith.truncf %26 : vector<128x8xf32> to vector<128x8xbf16>
    %cst_18 = arith.constant dense<0.000000e+00> : vector<128x128xf32>
    %28 = tpu.matmul %27, %25, %cst_18 {dimension_numbers = #tpu.dot_dimension_numbers<[1], [0], [0], [1], [0, 0, 1, 1], [], []>} : vector<128x8xbf16>, vector<8x128xbf16>, vector<128x128xf32> -> vector<128x128xf32>
    %29 = vector.broadcast %19 : vector<128x1xf32> to vector<128x128xf32>
    %30 = arith.addf %28, %29 : vector<128x128xf32>
    %cst_19 = arith.constant dense<0xFF800000> : vector<128xf32>
    %31 = vector.multi_reduction <maximumf>, %30, %cst_19 [0] : vector<128x128xf32> to vector<128xf32>
    %32 = vector.shape_cast %31 : vector<128xf32> to vector<1x128xf32>
    %33 = vector.broadcast %32 : vector<1x128xf32> to vector<128x128xf32>
    %34 = arith.subf %30, %33 : vector<128x128xf32>
    %35 = math.exp %34 : vector<128x128xf32>
    %cst_20 = arith.constant dense<0.000000e+00> : vector<128xf32>
    %36 = vector.multi_reduction <add>, %35, %cst_20 [0] : vector<128x128xf32> to vector<128xf32>
    %37 = vector.shape_cast %36 : vector<128xf32> to vector<1x128xf32>
    %cst_21 = arith.constant 1.000000e+00 : f32
    %38 = vector.broadcast %cst_21 : f32 to vector<1x128xf32>
    %39 = arith.divf %38, %37 : vector<1x128xf32>
    %40 = vector.extract_strided_slice %21 {offsets = [0, 0], sizes = [1, 1], strides = [1, 1]} : vector<1x4xf32> to vector<1x1xf32>
    %41 = vector.broadcast %40 : vector<1x1xf32> to vector<1x128xf32>
    %42 = arith.mulf %39, %41 : vector<1x128xf32>
    %43 = vector.broadcast %42 : vector<1x128xf32> to vector<128x128xf32>
    %44 = arith.mulf %35, %43 : vector<128x128xf32>
    %45 = arith.truncf %44 : vector<128x128xf32> to vector<128x128xbf16>
    %cst_22 = arith.constant dense<0.000000e+00> : vector<16x128xf32>
    %46 = tpu.matmul %23, %45, %cst_22 {dimension_numbers = #tpu.dot_dimension_numbers<[1], [0], [0], [1], [0, 0, 1, 1], [], []>} : vector<16x128xbf16>, vector<128x128xbf16>, vector<16x128xf32> -> vector<16x128xf32>
    %47 = vector.extract_strided_slice %10 {offsets = [8, 0], sizes = [8, 128], strides = [1, 1]} : vector<32x128xf32> to vector<8x128xf32>
    %48 = arith.truncf %47 : vector<8x128xf32> to vector<8x128xbf16>
    %49 = vector.extract_strided_slice %11 {offsets = [0, 8], sizes = [128, 8], strides = [1, 1]} : vector<128x32xf32> to vector<128x8xf32>
    %50 = arith.truncf %49 : vector<128x8xf32> to vector<128x8xbf16>
    %cst_23 = arith.constant dense<0.000000e+00> : vector<128x128xf32>
    %51 = tpu.matmul %50, %48, %cst_23 {dimension_numbers = #tpu.dot_dimension_numbers<[1], [0], [0], [1], [0, 0, 1, 1], [], []>} : vector<128x8xbf16>, vector<8x128xbf16>, vector<128x128xf32> -> vector<128x128xf32>
    %52 = vector.broadcast %19 : vector<128x1xf32> to vector<128x128xf32>
    %53 = arith.addf %51, %52 : vector<128x128xf32>
    %cst_24 = arith.constant dense<0xFF800000> : vector<128xf32>
    %54 = vector.multi_reduction <maximumf>, %53, %cst_24 [0] : vector<128x128xf32> to vector<128xf32>
    %55 = vector.shape_cast %54 : vector<128xf32> to vector<1x128xf32>
    %56 = vector.broadcast %55 : vector<1x128xf32> to vector<128x128xf32>
    %57 = arith.subf %53, %56 : vector<128x128xf32>
    %58 = math.exp %57 : vector<128x128xf32>
    %cst_25 = arith.constant dense<0.000000e+00> : vector<128xf32>
    %59 = vector.multi_reduction <add>, %58, %cst_25 [0] : vector<128x128xf32> to vector<128xf32>
    %60 = vector.shape_cast %59 : vector<128xf32> to vector<1x128xf32>
    %cst_26 = arith.constant 1.000000e+00 : f32
    %61 = vector.broadcast %cst_26 : f32 to vector<1x128xf32>
    %62 = arith.divf %61, %60 : vector<1x128xf32>
    %63 = vector.extract_strided_slice %21 {offsets = [0, 1], sizes = [1, 1], strides = [1, 1]} : vector<1x4xf32> to vector<1x1xf32>
    %64 = vector.broadcast %63 : vector<1x1xf32> to vector<1x128xf32>
    %65 = arith.mulf %62, %64 : vector<1x128xf32>
    %66 = vector.broadcast %65 : vector<1x128xf32> to vector<128x128xf32>
    %67 = arith.mulf %58, %66 : vector<128x128xf32>
    %68 = arith.truncf %67 : vector<128x128xf32> to vector<128x128xbf16>
    %cst_27 = arith.constant dense<0.000000e+00> : vector<16x128xf32>
    %69 = tpu.matmul %23, %68, %cst_27 {dimension_numbers = #tpu.dot_dimension_numbers<[1], [0], [0], [1], [0, 0, 1, 1], [], []>} : vector<16x128xbf16>, vector<128x128xbf16>, vector<16x128xf32> -> vector<16x128xf32>
    %70 = arith.addf %46, %69 : vector<16x128xf32>
    %71 = vector.extract_strided_slice %13 {offsets = [0, 0], sizes = [16, 16], strides = [1, 1]} : vector<16x32xf32> to vector<16x16xf32>
    %72 = arith.truncf %71 : vector<16x16xf32> to vector<16x16xbf16>
    %73 = arith.truncf %70 : vector<16x128xf32> to vector<16x128xbf16>
    %cst_28 = arith.constant dense<0.000000e+00> : vector<16x128xf32>
    %74 = tpu.matmul %72, %73, %cst_28 {dimension_numbers = #tpu.dot_dimension_numbers<[1], [0], [0], [1], [0, 0, 1, 1], [], []>} : vector<16x16xbf16>, vector<16x128xbf16>, vector<16x128xf32> -> vector<16x128xf32>
    %75 = vector.extract_strided_slice %12 {offsets = [16, 0], sizes = [16, 128], strides = [1, 1]} : vector<32x128xf32> to vector<16x128xf32>
    %76 = arith.truncf %75 : vector<16x128xf32> to vector<16x128xbf16>
    %77 = vector.extract_strided_slice %10 {offsets = [16, 0], sizes = [8, 128], strides = [1, 1]} : vector<32x128xf32> to vector<8x128xf32>
    %78 = arith.truncf %77 : vector<8x128xf32> to vector<8x128xbf16>
    %79 = vector.extract_strided_slice %11 {offsets = [0, 16], sizes = [128, 8], strides = [1, 1]} : vector<128x32xf32> to vector<128x8xf32>
    %80 = arith.truncf %79 : vector<128x8xf32> to vector<128x8xbf16>
    %cst_29 = arith.constant dense<0.000000e+00> : vector<128x128xf32>
    %81 = tpu.matmul %80, %78, %cst_29 {dimension_numbers = #tpu.dot_dimension_numbers<[1], [0], [0], [1], [0, 0, 1, 1], [], []>} : vector<128x8xbf16>, vector<8x128xbf16>, vector<128x128xf32> -> vector<128x128xf32>
    %82 = vector.broadcast %19 : vector<128x1xf32> to vector<128x128xf32>
    %83 = arith.addf %81, %82 : vector<128x128xf32>
    %cst_30 = arith.constant dense<0xFF800000> : vector<128xf32>
    %84 = vector.multi_reduction <maximumf>, %83, %cst_30 [0] : vector<128x128xf32> to vector<128xf32>
    %85 = vector.shape_cast %84 : vector<128xf32> to vector<1x128xf32>
    %86 = vector.broadcast %85 : vector<1x128xf32> to vector<128x128xf32>
    %87 = arith.subf %83, %86 : vector<128x128xf32>
    %88 = math.exp %87 : vector<128x128xf32>
    %cst_31 = arith.constant dense<0.000000e+00> : vector<128xf32>
    %89 = vector.multi_reduction <add>, %88, %cst_31 [0] : vector<128x128xf32> to vector<128xf32>
    %90 = vector.shape_cast %89 : vector<128xf32> to vector<1x128xf32>
    %cst_32 = arith.constant 1.000000e+00 : f32
    %91 = vector.broadcast %cst_32 : f32 to vector<1x128xf32>
    %92 = arith.divf %91, %90 : vector<1x128xf32>
    %93 = vector.extract_strided_slice %21 {offsets = [0, 2], sizes = [1, 1], strides = [1, 1]} : vector<1x4xf32> to vector<1x1xf32>
    %94 = vector.broadcast %93 : vector<1x1xf32> to vector<1x128xf32>
    %95 = arith.mulf %92, %94 : vector<1x128xf32>
    %96 = vector.broadcast %95 : vector<1x128xf32> to vector<128x128xf32>
    %97 = arith.mulf %88, %96 : vector<128x128xf32>
    %98 = arith.truncf %97 : vector<128x128xf32> to vector<128x128xbf16>
    %cst_33 = arith.constant dense<0.000000e+00> : vector<16x128xf32>
    %99 = tpu.matmul %76, %98, %cst_33 {dimension_numbers = #tpu.dot_dimension_numbers<[1], [0], [0], [1], [0, 0, 1, 1], [], []>} : vector<16x128xbf16>, vector<128x128xbf16>, vector<16x128xf32> -> vector<16x128xf32>
    %100 = vector.extract_strided_slice %10 {offsets = [24, 0], sizes = [8, 128], strides = [1, 1]} : vector<32x128xf32> to vector<8x128xf32>
    %101 = arith.truncf %100 : vector<8x128xf32> to vector<8x128xbf16>
    %102 = vector.extract_strided_slice %11 {offsets = [0, 24], sizes = [128, 8], strides = [1, 1]} : vector<128x32xf32> to vector<128x8xf32>
    %103 = arith.truncf %102 : vector<128x8xf32> to vector<128x8xbf16>
    %cst_34 = arith.constant dense<0.000000e+00> : vector<128x128xf32>
    %104 = tpu.matmul %103, %101, %cst_34 {dimension_numbers = #tpu.dot_dimension_numbers<[1], [0], [0], [1], [0, 0, 1, 1], [], []>} : vector<128x8xbf16>, vector<8x128xbf16>, vector<128x128xf32> -> vector<128x128xf32>
    %105 = vector.broadcast %19 : vector<128x1xf32> to vector<128x128xf32>
    %106 = arith.addf %104, %105 : vector<128x128xf32>
    %cst_35 = arith.constant dense<0xFF800000> : vector<128xf32>
    %107 = vector.multi_reduction <maximumf>, %106, %cst_35 [0] : vector<128x128xf32> to vector<128xf32>
    %108 = vector.shape_cast %107 : vector<128xf32> to vector<1x128xf32>
    %109 = vector.broadcast %108 : vector<1x128xf32> to vector<128x128xf32>
    %110 = arith.subf %106, %109 : vector<128x128xf32>
    %111 = math.exp %110 : vector<128x128xf32>
    %cst_36 = arith.constant dense<0.000000e+00> : vector<128xf32>
    %112 = vector.multi_reduction <add>, %111, %cst_36 [0] : vector<128x128xf32> to vector<128xf32>
    %113 = vector.shape_cast %112 : vector<128xf32> to vector<1x128xf32>
    %cst_37 = arith.constant 1.000000e+00 : f32
    %114 = vector.broadcast %cst_37 : f32 to vector<1x128xf32>
    %115 = arith.divf %114, %113 : vector<1x128xf32>
    %116 = vector.extract_strided_slice %21 {offsets = [0, 3], sizes = [1, 1], strides = [1, 1]} : vector<1x4xf32> to vector<1x1xf32>
    %117 = vector.broadcast %116 : vector<1x1xf32> to vector<1x128xf32>
    %118 = arith.mulf %115, %117 : vector<1x128xf32>
    %119 = vector.broadcast %118 : vector<1x128xf32> to vector<128x128xf32>
    %120 = arith.mulf %111, %119 : vector<128x128xf32>
    %121 = arith.truncf %120 : vector<128x128xf32> to vector<128x128xbf16>
    %cst_38 = arith.constant dense<0.000000e+00> : vector<16x128xf32>
    %122 = tpu.matmul %76, %121, %cst_38 {dimension_numbers = #tpu.dot_dimension_numbers<[1], [0], [0], [1], [0, 0, 1, 1], [], []>} : vector<16x128xbf16>, vector<128x128xbf16>, vector<16x128xf32> -> vector<16x128xf32>
    %123 = arith.addf %99, %122 : vector<16x128xf32>
    %124 = vector.extract_strided_slice %13 {offsets = [0, 16], sizes = [16, 16], strides = [1, 1]} : vector<16x32xf32> to vector<16x16xf32>
    %125 = arith.truncf %124 : vector<16x16xf32> to vector<16x16xbf16>
    %126 = arith.truncf %123 : vector<16x128xf32> to vector<16x128xbf16>
    %cst_39 = arith.constant dense<0.000000e+00> : vector<16x128xf32>
    %127 = tpu.matmul %125, %126, %cst_39 {dimension_numbers = #tpu.dot_dimension_numbers<[1], [0], [0], [1], [0, 0, 1, 1], [], []>} : vector<16x16xbf16>, vector<16x128xbf16>, vector<16x128xf32> -> vector<16x128xf32>
    %128 = arith.addf %74, %127 : vector<16x128xf32>
    %c0_40 = arith.constant 0 : index
    %c0_41 = arith.constant 0 : index
    %129 = vector.load %arg10[%c0_40, %c0_41] : memref<16x1xf32, #tpu.memory_space<vmem>>, vector<16x1xf32>
    %130 = vector.broadcast %129 : vector<16x1xf32> to vector<16x128xf32>
    %131 = arith.mulf %128, %130 : vector<16x128xf32>
    %c0_42 = arith.constant 0 : index
    %c0_43 = arith.constant 0 : index
    %132 = vector.load %arg11[%c0_42, %c0_43] : memref<16x1xf32, #tpu.memory_space<vmem>>, vector<16x1xf32>
    %133 = vector.broadcast %132 : vector<16x1xf32> to vector<16x128xf32>
    %134 = arith.addf %131, %133 : vector<16x128xf32>
    %135 = arith.addf %134, %4 : vector<16x128xf32>
    %c0_44 = arith.constant 0 : index
    %c0_45 = arith.constant 0 : index
    %c0_46 = arith.constant 0 : index
    %136 = vector.load %arg12[%c0_44, %c0_45, %c0_46] : memref<1x16x128xf32, #tpu.memory_space<vmem>>, vector<1x16x128xf32>
    %137 = vector.shape_cast %136 : vector<1x16x128xf32> to vector<16x128xf32>
    %138 = vector.shape_cast %135 : vector<16x128xf32> to vector<1x16x128xf32>
    tpu.vector_store %arg12[%c0_44, %c0_45, %c0_46], %138 {strides = array<i32>} : memref<1x16x128xf32, #tpu.memory_space<vmem>>, vector<1x16x128xf32>,
    return
  }
  func.func @transform_0(%arg0: i32, %arg1: i32) -> (i32, i32, i32) {
    %c0_i32 = arith.constant 0 : i32
    %c0_i32_0 = arith.constant 0 : i32
    return %arg0, %c0_i32, %arg1 : i32, i32, i32
  }
  func.func @transform_1(%arg0: i32, %arg1: i32) -> (i32, i32, i32) {
    %c0_i32 = arith.constant 0 : i32
    %c0_i32_0 = arith.constant 0 : i32
    %c0_i32_1 = arith.constant 0 : i32
    return %arg0, %c0_i32, %c0_i32_0 : i32, i32, i32
  }
  func.func @transform_2(%arg0: i32, %arg1: i32) -> (i32, i32) {
    %c0_i32 = arith.constant 0 : i32
    %c0_i32_0 = arith.constant 0 : i32
    %c0_i32_1 = arith.constant 0 : i32
    return %c0_i32, %c0_i32_0 : i32, i32
  }
  func.func @transform_3(%arg0: i32, %arg1: i32) -> (i32, i32) {
    %c0_i32 = arith.constant 0 : i32
    %c0_i32_0 = arith.constant 0 : i32
    %c0_i32_1 = arith.constant 0 : i32
    return %c0_i32, %c0_i32_0 : i32, i32
  }
  func.func @transform_4(%arg0: i32, %arg1: i32) -> (i32, i32) {
    %c0_i32 = arith.constant 0 : i32
    %c0_i32_0 = arith.constant 0 : i32
    %c0_i32_1 = arith.constant 0 : i32
    return %c0_i32, %c0_i32_0 : i32, i32
  }
  func.func @transform_5(%arg0: i32, %arg1: i32) -> (i32, i32) {
    %c0_i32 = arith.constant 0 : i32
    %c0_i32_0 = arith.constant 0 : i32
    %c0_i32_1 = arith.constant 0 : i32
    return %c0_i32, %c0_i32_0 : i32, i32
  }
  func.func @transform_6(%arg0: i32, %arg1: i32) -> (i32, i32, i32) {
    %c0_i32 = arith.constant 0 : i32
    %c0_i32_0 = arith.constant 0 : i32
    %c0_i32_1 = arith.constant 0 : i32
    return %arg0, %c0_i32, %c0_i32_0 : i32, i32, i32
  }
  func.func @transform_7(%arg0: i32, %arg1: i32) -> (i32, i32) {
    %c0_i32 = arith.constant 0 : i32
    %c0_i32_0 = arith.constant 0 : i32
    %c0_i32_1 = arith.constant 0 : i32
    return %c0_i32, %c0_i32_0 : i32, i32
  }
  func.func @transform_8(%arg0: i32, %arg1: i32) -> (i32, i32) {
    %c0_i32 = arith.constant 0 : i32
    %c0_i32_0 = arith.constant 0 : i32
    %c0_i32_1 = arith.constant 0 : i32
    return %c0_i32, %c0_i32_0 : i32, i32
  }
  func.func @transform_9(%arg0: i32, %arg1: i32) -> (i32, i32) {
    %c0_i32 = arith.constant 0 : i32
    %c0_i32_0 = arith.constant 0 : i32
    %c0_i32_1 = arith.constant 0 : i32
    return %c0_i32, %c0_i32_0 : i32, i32
  }
  func.func @transform_10(%arg0: i32, %arg1: i32) -> (i32, i32, i32) {
    %c0_i32 = arith.constant 0 : i32
    %c0_i32_0 = arith.constant 0 : i32
    return %arg0, %c0_i32, %arg1 : i32, i32, i32
  }
}

</mosaic_0001>

<bundles_post_ra>
// kernel: self_trans_forward.1
= control target key start
LH: loop header
LB: loop body
LE: loop exit
PB: predicated region body
PF: predicated region fallthrough
CT: control target
= control target key end

     0   :  { %s3951_s0 = inlined_call_operand.vmem [shape: f32[2,16,256], index: 0, kind: input, shape index: {}]   ;;  %s3952_s1 = inlined_call_operand.vmem [shape: bf16[2,16,128], index: 1, kind: input, shape index: {}]   ;;  %s3953_s2 = inlined_call_operand.vmem [shape: bf16[32,16], index: 2, kind: input, shape index: {}]   ;;  %s3954_s3 = inlined_call_operand.vmem [shape: f32[32,1], index: 3, kind: input, shape index: {}]   ;;  %s3955_s4 = inlined_call_operand.vmem [shape: bf16[64,16], index: 4, kind: input, shape index: {}]   ;;  %s3956_s5 = inlined_call_operand.vmem [shape: f32[64,1], index: 5, kind: input, shape index: {}]   ;;  %s3957_s6 = inlined_call_operand.vmem [shape: f32[2,1,4], index: 6, kind: input, shape index: {}]   ;;  %s3958_s7 = inlined_call_operand.vmem [shape: f32[16,32], index: 7, kind: input, shape index: {}]   ;;  %s3959_s8 = inlined_call_operand.vmem [shape: f32[16,1], index: 8, kind: input, shape index: {}]   ;;  %s3960_s9 = inlined_call_operand.vmem [shape: f32[16,1], index: 9, kind: input, shape index: {}]   ;;  %s3961_s10 = inlined_call_operand.vmem [shape: f32[2,16,256], index: 10, kind: output, shape index: {}]  }
   0x1   :  { %3963 = sst [smem:[#allocation7_spill]] %s3951_s0 }
   0x2   :  { %3964 = sst [smem:[#allocation8_spill]] %s3961_s10 }
   0x3   :  { %s3012_s13 = smov 0   ;;  %s3014_s14 = smov 0  }
   0x4   :  { %s3016_s15 = smov 0   ;;  %s3018_s16 = smov 0  }
   0x5   :  { %s3020_s17 = smov 0   ;;  %s3022_s18 = smov 0  }
   0x6   :  { %s3024_s19 = smov 0  }
   0x7 LB: > { %s29_s20 = sadd.s32 1, %s2937_s17  ;;  %s32_s21 = sadd.s32 1, %s2941_s18  ;;  %s2945_s19 = sphi %s3024_s19, %s20_s19   ;;  %s2941_s18 = sphi %s3022_s18, %s3976_s18   ;;  %s2937_s17 = sphi %s3020_s17, %s3975_s17   ;;  %s2933_s16 = sphi %s3018_s16, %s3974_s16   ;;  %s2929_s15 = sphi %s3016_s15, %s3973_s15   ;;  %s2925_s14 = sphi %s3014_s14, %s3972_s14   ;;  %s2921_s13 = sphi %s3012_s13, %s3971_s13  }
   0x8   : > { %p30_p0 = scmp.ge.s32.totalorder %s29_s20, 2  ;;  %s2334_s22 = sadd.s32 4294967295, %s2945_s19  }
   0x9   : > { %p48_p1 = scmp.ne.s32.totalorder %s2925_s14, %s2921_s13  ;;  %p49_p2 = scmp.eq.s32.totalorder %s2945_s19, 0 }
   0xa   : > { %s3978_s20 = smov (%p30_p0, %s29_s20), 0  ;;  %s3980_s21 = smov (!%p30_p0, %s32_s21), %s2941_s18 }
   0xb   : > { %3965 = sst [smem:[#allocation6_spill]] %s3978_s20  ;;  %p34_p3 = scmp.ge.s32.totalorder %s3980_s21, 2 }
   0xc   : > { %p279_p4 = scmp.eq.s32.totalorder %s2334_s22, 3  ;;  %s37_s23 = ssub.s32 %s2937_s17, %s3978_s20 }
   0xd   : > { %p50_p5 = por %p49_p2, %p48_p1  ;;  %s3982_s21 = smov (%p34_p3, %s3980_s21), 0 }
   0xe   : > { %p3060_p6 = por %p279_p4, %p48_p1  ;;  %s36_s25 = ssub.s32 %s2941_s18, %s3982_s21 }
   0xf   : > { %s38_s26 = sor.u32 %s37_s23, %s36_s25  ;;  %s41_s27 = sadd.s32 1, %s2925_s14 }
  0x10   : > { %p39_p7 = scmp.eq.s32.totalorder %s38_s26, 0  ;;  %p2337_p8 = scmp.ge.s32.totalorder %s2945_s19, 4 }
  0x12   : > { %s3068_s28 = scalar_select %p39_p7, %s2925_s14, %s41_s27  }
  0x13   : > { %322 = sbr.rel (%p2337_p8) target bundleno = 35 (0x23), region = 44 }
  0x18   : > { %325 = sbr.rel (!%p50_p5) target bundleno = 35 (0x23), region = 48  ;;  %s327_s29 = sand.u32 (%p50_p5), 1, %s2925_s14  }
  0x19   : > { %s2339_s30 = sshll.u32 (%p50_p5), %s2941_s18, 2  ;;  %s2338_s11 = sshll.u32 (%p50_p5), %s327_s29, 4 }
  0x1a   : > { %s331_s12 = sadd.s32 (%p50_p5), %s2937_s17, %s2339_s30  ;;  %s3967_s0 = sld [smem:[#allocation7_spill]] (%p50_p5) }
  0x1b   : > { %s2340_s22 = sshll.u32 (%p50_p5), %s331_s12, 3  ;;  %s329_s25 = scalar_lea.vmem (%p50_p5), [#allocation4], %s2338_s11 }
  0x20   : > { %s333_s23 = scalar_lea.vmem %s3967_s0, %s2340_s22 }
  0x21   : > { %v364_v0 = vld [vmem:[%s333_s23] sm:$0xff]  ;;  %v366_v1 = vld [vmem:[%s333_s23 + $0x10] sm:$0xff] }
  0x22   : > { %365 = vst [vmem:[%s329_s25] sm:$0xff] %v364_v0  ;;  %367 = vst [vmem:[%s329_s25 + $0x8] sm:$0xff] %v366_v1 }
  0x23 PF: > { %p2341_p9 = scmp.ge.s32.totalorder %s2945_s19, 1  ;;  %p386_p10 = scmp.lt.s32.totalorder %s2945_s19, 5 }
  0x25   : > { %p387_p11 = pnand %p2341_p9, %p386_p10 }
  0x26   : > { %s393_s26 = sand.u32 (!%p387_p11), 1, %s2921_s13   ;;  %p437_p12 = scmp.lt.s32.totalorder (!%p387_p11), %s2933_s16, 1 }
  0x27   : > { %390 = sbr.rel (%p387_p11) target bundleno = 1805 (0x70d), region = 94  ;;  %s2342_s10 = sshll.u32 (!%p387_p11), %s393_s26, 4 }
  0x28   : > { %s3092_s25 = scalar_lea.vmem (!%p387_p11), [#allocation4], %s2342_s10  ;;  %s3094_s0 = scalar_lea.vmem (!%p387_p11), [#allocation5], %s2342_s10 }
  0x29   : > { %p2346_p13 = scmp.ne.s32.totalorder (!%p387_p11), %s2929_s15, 0 }
  0x2c   : > { %s3082_s20 = scalar_select %p437_p12, %s2933_s16, 1 }
  0x2d   : > { %449 = sbr.rel (%p2346_p13) target bundleno = 438 (0x1b6), region = 102 }
  0x2e   : > { %s2399_s27 = sshll.u32 %s3082_s20, 3 }
  0x2f   : > { %s441_s23 = scalar_lea.vmem %s3952_s1, %s2399_s27 }
  0x32   : > { %v2739_v2 = vld [vmem:[%s441_s23] sm:$0xff]   ;;  %vm534_vm0 = vcmask 130048   ;;  %v2741_v4 = vld [vmem:[%s3955_s4 + $0x10] sm:$0xff]   ;;  %v2742_v5 = vld [vmem:[%s3955_s4 + $0x8] sm:$0xff]   ;;  %v2947_v7 = vmov 0   ;;  %vm644_vm1 = vcmask 261120  }
  0x33   : > { %v2740_v3 = vld [vmem:[%s3955_s4] sm:$0xff]   ;;  %2484 = vmatprep.subr.bf16.mxu0 %v2739_v2  ;;  %2664 = vmatprep.subr.bf16.mxu1 %v2739_v2  ;;  %v2743_v6 = vld [vmem:[%s3955_s4 + $0x18] sm:$0xff]   ;;  %v462_v9 = vld [vmem:[%s3956_s5 + $0x10] sm:$0xff] }
  0x34   : > { %2485 = vmatpush3.bf16.msra.mxu0 %v2739_v2  ;;  %2665 = vmatpush3.bf16.msra.mxu1 %v2739_v2  ;;  %v460_v8 = vld [vmem:[%s3956_s5] sm:$0xff]  ;;  %v461_v10 = vld [vmem:[%s3956_s5 + $0x8] sm:$0xff]  ;;  %v463_v11 = vld [vmem:[%s3956_s5 + $0x18] sm:$0xff] }
  0x35   : > { %2486 = vmatprep.mubr.msk.bf16.mxu0 %vm534_vm0, %v2740_v3  ;;  %2490 = vmatprep.mubr.msk.bf16.mxu1 %vm534_vm0, %v2741_v4  ;;  %v464_v12 = vld [vmem:[%s3956_s5 + $0x20] sm:$0xff]  ;;  %v465_v13 = vld [vmem:[%s3956_s5 + $0x28] sm:$0xff]  ;;  %v466_v14 = vld [vmem:[%s3956_s5 + $0x30] sm:$0xff] }
  0x36   : > { %2737 = vset.pattern.permute.xlu0 %v2947_v7  ;;  %2738 = vset.pattern.permute.xlu1 %v2947_v7  ;;  %v467_v15 = vld [vmem:[%s3956_s5 + $0x38] sm:$0xff] }
  0x37   : > { %2487 = vmatmul.mubr.msk.bf16.vlgmr.msra.gmra.mxu0 %vm534_vm0, %v2742_v5  ;;  %2491 = vmatmul.mubr.msk.bf16.vlgmr.msra.gmra.mxu1 %vm534_vm0, %v2743_v6 }
  0x38   : > { %470 = vperm.xlu0 %2737, %v460_v8   ;;  %480 = vperm.xlu1 %2738, %v462_v9  }
  0x3c   : > { %475 = vperm.xlu0 %2737, %v461_v10   ;;  %485 = vperm.xlu1 %2738, %v463_v11  }
  0x40   : > { %490 = vperm.xlu0 %2737, %v464_v12   ;;  %495 = vperm.xlu1 %2738, %v465_v13  }
  0x44   : > { %500 = vperm.xlu0 %2737, %v466_v14   ;;  %505 = vperm.xlu1 %2738, %v467_v15  }
  0xb3   : > { %v471_v16 = vpop.permute.xlu0 %470  ;;  %v481_v17 = vpop.permute.xlu1 %480 }
  0xb7   : > { %v476_v18 = vpop.permute.xlu0 %475  ;;  %v486_v19 = vpop.permute.xlu1 %485 }
  0xbb   : > { %v491_v20 = vpop.permute.xlu0 %490  ;;  %v496_v21 = vpop.permute.xlu1 %495 }
  0xbf   : > { %v501_v22 = vpop.permute.xlu0 %500  ;;  %v506_v26 = vpop.permute.xlu1 %505 }
  0xf7   : > { %v2488_v23 = vpop.f32.mrf.mxu0  ;;  %v2492_v24 = vpop.f32.mrf.mxu1 }
  0xf8   : > { %v606_v25 = vadd.f32 %v2492_v24, %v501_v22  ;;  %v590_v38 = vadd.f32 %v2488_v23, %v481_v17 }
  0xf9   : > { %v581_v27 = vpop.f32.mrf.mxu0  ;;  %v597_v28 = vpop.f32.mrf.mxu1 }
  0xfa   : > { %663 = vst [vmem:[#allocation3 + $0x18] sm:$0xff] %v606_v25  ;;  %v582_v29 = vadd.f32 %v581_v27, %v471_v16  ;;  %v598_v30 = vadd.f32 %v597_v28, %v491_v20 }
  0xfb   : > { %v2489_v31 = vpop.f32.mrf.mxu0  ;;  %v2493_v32 = vpop.f32.mrf.mxu1 }
  0xfc   : > { %661 = vst [vmem:[#allocation3 + $0x10] sm:$0xff] %v598_v30  ;;  %612 = vxpose.xlu0.b32.start [1/4] (short) %v582_v29, 128  ;;  %v609_v33 = vadd.f32 %v2493_v32, %v506_v26  ;;  %v593_v39 = vadd.f32 %v2489_v31, %v486_v19 }
  0xfd   : > { %v584_v34 = vpop.f32.mrf.mxu0  ;;  %v600_v35 = vpop.f32.mrf.mxu1 }
  0xfe   : > { %v585_v36 = vadd.f32 %v584_v34, %v476_v18  ;;  %664 = vst [vmem:[#allocation3 + $0x8] sm:$0xff] %v609_v33  ;;  %v601_v37 = vadd.f32 %v600_v35, %v496_v21 }
 0x100   : > { %613 = vxpose.xlu0.b32.cont [2/4] (short) %v585_v36, 128  ;;  %662 = vst [vmem:[#allocation3] sm:$0xff] %v601_v37 }
 0x104   : > { %614 = vxpose.xlu0.b32.cont [3/4] (short) %v590_v38, 128 }
 0x108   : > { %615 = vxpose.xlu0.b32.end [4/4] (short) %v593_v39, 128 }
 0x178   : > { %v628_v40 = vpop.trf.xlu0 }
 0x179   : > { %645 = vst.msk [vmem:[#allocation2] sm:$0xff] %vm644_vm1, %v628_v40 }
 0x17c   : > { %v629_v41 = vpop.trf.xlu0 }
 0x17d   : > { %646 = vst.msk [vmem:[#allocation2 + $0x8] sm:$0xff] %vm644_vm1, %v629_v41 }
 0x180   : > { %v630_v42 = vpop.trf.xlu0 }
 0x181   : > { %647 = vst.msk [vmem:[#allocation2 + $0x10] sm:$0xff] %vm644_vm1, %v630_v42 }
 0x184   : > { %v631_v43 = vpop.trf.xlu0 }
 0x185   : > { %648 = vst.msk [vmem:[#allocation2 + $0x18] sm:$0xff] %vm644_vm1, %v631_v43 }
 0x188   : > { %v632_v44 = vpop.trf.xlu0 }
 0x189   : > { %649 = vst.msk [vmem:[#allocation2 + $0x20] sm:$0xff] %vm644_vm1, %v632_v44 }
 0x18c   : > { %v633_v45 = vpop.trf.xlu0 }
 0x18d   : > { %650 = vst.msk [vmem:[#allocation2 + $0x28] sm:$0xff] %vm644_vm1, %v633_v45 }
 0x190   : > { %v634_v46 = vpop.trf.xlu0 }
 0x191   : > { %651 = vst.msk [vmem:[#allocation2 + $0x30] sm:$0xff] %vm644_vm1, %v634_v46 }
 0x194   : > { %v635_v47 = vpop.trf.xlu0 }
 0x195   : > { %652 = vst.msk [vmem:[#allocation2 + $0x38] sm:$0xff] %vm644_vm1, %v635_v47 }
 0x198   : > { %v636_v48 = vpop.trf.xlu0 }
 0x199   : > { %653 = vst.msk [vmem:[#allocation2 + $0x40] sm:$0xff] %vm644_vm1, %v636_v48 }
 0x19c   : > { %v637_v49 = vpop.trf.xlu0 }
 0x19d   : > { %654 = vst.msk [vmem:[#allocation2 + $0x48] sm:$0xff] %vm644_vm1, %v637_v49 }
 0x1a0   : > { %v638_v50 = vpop.trf.xlu0 }
 0x1a1   : > { %655 = vst.msk [vmem:[#allocation2 + $0x50] sm:$0xff] %vm644_vm1, %v638_v50 }
 0x1a4   : > { %v639_v51 = vpop.trf.xlu0 }
 0x1a5   : > { %656 = vst.msk [vmem:[#allocation2 + $0x58] sm:$0xff] %vm644_vm1, %v639_v51 }
 0x1a8   : > { %v640_v52 = vpop.trf.xlu0 }
 0x1a9   : > { %657 = vst.msk [vmem:[#allocation2 + $0x60] sm:$0xff] %vm644_vm1, %v640_v52 }
 0x1ac   : > { %v641_v53 = vpop.trf.xlu0 }
 0x1ad   : > { %658 = vst.msk [vmem:[#allocation2 + $0x68] sm:$0xff] %vm644_vm1, %v641_v53 }
 0x1b0   : > { %v642_v54 = vpop.trf.xlu0 }
 0x1b1   : > { %659 = vst.msk [vmem:[#allocation2 + $0x70] sm:$0xff] %vm644_vm1, %v642_v54 }
 0x1b4   : > { %v643_v55 = vpop.trf.xlu0 }
 0x1b5   : > { %660 = vst.msk [vmem:[#allocation2 + $0x78] sm:$0xff] %vm644_vm1, %v643_v55 }
 0x1b6 PF: > { %v665_v56 = vld [vmem:[%s3092_s25] sm:$0xff]  ;;  %v666_v57 = vld [vmem:[%s3092_s25 + $0x8] sm:$0xff]  ;;  %vm706_vm2 = vcmask 130048   ;;  %v2948_v60 = vmov 0   ;;  %v2949_v7 = vmov 1   ;;  %s2950_s30 = smov 120   ;;  %s3968_s10 = scalar_lea.vmem %s3957_s6, %s3082_s20 }
 0x1b7   : > { %v671_v58 = vpack.c.bf16 %v666_v57, %v665_v56  ;;  %v2751_v59 = vld [vmem:[%s3953_s2] sm:$0xff]   ;;  %2744 = vset.pattern.permute.xlu0 %v2948_v60  ;;  %v2752_v62 = vld [vmem:[%s3953_s2 + $0x8] sm:$0xff]   ;;  %v764_v2 = vld [vmem:[#allocation2 + $0x10] sm:$0xff]  ;;  %2745 = vset.pattern.permute.xlu1 %v2949_v7  ;;  %vm844_vm3 = vcmask 64512   ;;  %vm869_vm4 = vcmask 1043456   ;;  %s2951_s20 = smov 104  }
 0x1b8   : > { %v672_v61 = vld [vmem:[%s3954_s3] sm:$0xff]  ;;  %2496 = vmatprep.mubr.msk.bf16.mxu0 %vm706_vm2, %v2751_v59  ;;  %v763_v0 = vld [vmem:[#allocation2 + $0x8] sm:$0xff]  ;;  %v765_v3 = vld [vmem:[#allocation2 + $0x18] sm:$0xff]  ;;  %s2952_s26 = smov 112   ;;  %vm2954_vm5 = vmmov 0   ;;  %s3969_s22 = sld [smem:[#allocation8_spill]] (%p3060_p6) }
 0x1b9   : > { %2494 = vmatprep.subr.bf16.mxu0 %v671_v58  ;;  %v762_v63 = vld [vmem:[#allocation2] sm:$0xff]  ;;  %678 = vperm.xlu0 %2744, %v672_v61   ;;  %v673_v4 = vld [vmem:[%s3954_s3 + $0x8] sm:$0xff]  ;;  %v3172_v8 = vpack.c.bf16 %v765_v3, %v764_v2  ;;  %v768_v9 = vld [vmem:[#allocation2 + $0x30] sm:$0xff] }
 0x1ba   : > { %2495 = vmatpush3.bf16.msra.mxu0 %v671_v58  ;;  %v3166_v1 = vpack.c.bf16 %v763_v0, %v762_v63  ;;  %v766_v5 = vld [vmem:[#allocation2 + $0x20] sm:$0xff]  ;;  %v767_v6 = vld [vmem:[#allocation2 + $0x28] sm:$0xff]  ;;  %v769_v10 = vld [vmem:[#allocation2 + $0x38] sm:$0xff] }
 0x1bb   : > { %v3175_v11 = vpack.c.bf16 %v767_v6, %v766_v5  ;;  %v770_v12 = vld [vmem:[#allocation2 + $0x40] sm:$0xff]  ;;  %v771_v13 = vld [vmem:[#allocation2 + $0x48] sm:$0xff]  ;;  %v3178_v14 = vpack.c.bf16 %v769_v10, %v768_v9  ;;  %v772_v15 = vld [vmem:[#allocation2 + $0x50] sm:$0xff] }
 0x1bc   : > { %1105 = vrot.lane.b32.xlu1 %v3166_v1, %s2950_s30  ;;  %v773_v16 = vld [vmem:[#allocation2 + $0x58] sm:$0xff]  ;;  %v3181_v17 = vpack.c.bf16 %v771_v13, %v770_v12  ;;  %v774_v18 = vld [vmem:[#allocation2 + $0x60] sm:$0xff]  ;;  %v775_v19 = vld [vmem:[#allocation2 + $0x68] sm:$0xff]  ;;  %2502 = vmatprep.mubr.msk.bf16.mxu1 %vm844_vm3, %v3166_v1 }
 0x1bd   : > { %2497 = vmatmul.mubr.msk.bf16.vlgmr.msra.gmra.mxu0 %vm706_vm2, %v2752_v62  ;;  %683 = vperm.xlu0 %2744, %v673_v4   ;;  %v3184_v20 = vpack.c.bf16 %v773_v16, %v772_v15  ;;  %v776_v21 = vld [vmem:[#allocation2 + $0x70] sm:$0xff]  ;;  %v777_v22 = vld [vmem:[#allocation2 + $0x78] sm:$0xff]  ;;  %v3187_v23 = vpack.c.bf16 %v775_v19, %v774_v18  ;;  %v3198_v25 = vld [vmem:[%s3968_s10] sm:$0x1] }
 0x1be   : > { %v3190_v24 = vpack.c.bf16 %v777_v22, %v776_v21  ;;  %v674_v26 = vld [vmem:[%s3954_s3 + $0x10] sm:$0xff]  ;;  %v675_v27 = vld [vmem:[%s3954_s3 + $0x18] sm:$0xff] }
 0x1c0   : > { %1107 = vrot.lane.b32.xlu1 %v3172_v8, %s2950_s30 }
 0x1c1   : > { %1109 = vrot.lane.b32.xlu0 %v3175_v11, %s2950_s30 }
 0x1c4   : > { %1111 = vrot.lane.b32.xlu1 %v3178_v14, %s2950_s30 }
 0x1c5   : > { %1113 = vrot.lane.b32.xlu0 %v3181_v17, %s2950_s30 }
 0x1c8   : > { %1115 = vrot.lane.b32.xlu1 %v3184_v20, %s2950_s30 }
 0x1c9   : > { %1117 = vrot.lane.b32.xlu0 %v3187_v23, %s2950_s30 }
 0x1cc   : > { %1119 = vrot.lane.b32.xlu1 %v3190_v24, %s2950_s30  ;;  %s2395_s30 = sshll.u32 (%p3060_p6), %s2933_s16, 2 }
 0x1cd   : > { %1064 = vperm.xlu0 %2744, %v3198_v25   ;;  %s2201_s27 = sadd.s32 (%p3060_p6), %s2929_s15, %s2395_s30 }
 0x1ce   : > { %s2396_s11 = sshll.u32 (%p3060_p6), %s2201_s27, 3 }
 0x1cf   : > { %s2203_s23 = scalar_lea.vmem (%p3060_p6), %s3969_s22, %s2396_s11 }
 0x1d0   : > { %1338 = vperm.xlu1 %2745, %v3198_v25  }
 0x1d1   : > { %688 = vperm.xlu0 %2744, %v674_v26  }
 0x1d4   : > { %2746 = vset.pattern.permute.xlu1 %v2948_v60 }
 0x1d5   : > { %693 = vperm.xlu1 %2746, %v675_v27   ;;  %1456 = vrot.lane.b32.xlu0 %v3166_v1, %s2952_s26 }
 0x1d9   : > { %1722 = vrot.lane.b32.xlu1 %v3166_v1, %s2951_s20  ;;  %1458 = vrot.lane.b32.xlu0 %v3172_v8, %s2952_s26  ;;  %v2953_v1 = vmov 0.0  }
 0x1dd   : > { %1724 = vrot.lane.b32.xlu1 %v3172_v8, %s2951_s20  ;;  %1460 = vrot.lane.b32.xlu0 %v3175_v11, %s2952_s26 }
 0x1e1   : > { %1726 = vrot.lane.b32.xlu1 %v3175_v11, %s2951_s20  ;;  %1462 = vrot.lane.b32.xlu0 %v3178_v14, %s2952_s26 }
 0x1e5   : > { %1728 = vrot.lane.b32.xlu1 %v3178_v14, %s2951_s20  ;;  %1464 = vrot.lane.b32.xlu0 %v3181_v17, %s2952_s26 }
 0x1e9   : > { %1730 = vrot.lane.b32.xlu1 %v3181_v17, %s2951_s20  ;;  %1466 = vrot.lane.b32.xlu0 %v3184_v20, %s2952_s26 }
 0x1ed   : > { %1732 = vrot.lane.b32.xlu1 %v3184_v20, %s2951_s20  ;;  %1468 = vrot.lane.b32.xlu0 %v3187_v23, %s2952_s26 }
 0x1f1   : > { %1734 = vrot.lane.b32.xlu1 %v3187_v23, %s2951_s20  ;;  %1470 = vrot.lane.b32.xlu0 %v3190_v24, %s2952_s26 }
 0x1f5   : > { %1736 = vrot.lane.b32.xlu1 %v3190_v24, %s2951_s20 }
 0x22e   : > { %v1106_v28 = vpop.permute.xlu1 %1105 }
 0x22f   : > { %2520 = vmatprep.mubr.msk.bf16.mxu0 %vm844_vm3, %v1106_v28 }
 0x232   : > { %v1108_v41 = vpop.permute.xlu1 %1107 }
 0x234   : > { %v679_v29 = vpop.permute.xlu0 %678 }
 0x236   : > { %v1112_v43 = vpop.permute.xlu1 %1111 }
 0x238   : > { %v684_v35 = vpop.permute.xlu0 %683 }
 0x23a   : > { %v1116_v45 = vpop.permute.xlu1 %1115 }
 0x23c   : > { %v1110_v42 = vpop.permute.xlu0 %1109 }
 0x23e   : > { %v1120_v47 = vpop.permute.xlu1 %1119 }
 0x240   : > { %v1114_v44 = vpop.permute.xlu0 %1113 }
 0x244   : > { %v1118_v46 = vpop.permute.xlu0 %1117 }
 0x27d   : > { %v3213_v30 = vpop.f32.mrf.mxu0 }
 0x27f   : > { %v747_v31 = vpop.f32.mrf.mxu0 }
 0x280   : > { %v748_v32 = vadd.f32 %v747_v31, %v679_v29 }
 0x281   : > { %v3215_v33 = vpop.f32.mrf.mxu0 }
 0x282   : > { %v835_v34 = vpack.c.bf16 %v748_v32, %v748_v32 }
 0x283   : > { %v750_v36 = vpop.f32.mrf.mxu0 }
 0x284   : > { %v751_v37 = vadd.f32 %v750_v36, %v684_v35  ;;  %2666 = vmatprep.subr.msk.bf16.mxu1 %vm869_vm4, %v835_v34  ;;  %v871_v38 = vsel %vm869_vm4, %v835_v34, 0 }
 0x285   : > { %2501 = vmatpush3.bf16.msra.mxu1 %v871_v38 }
 0x286   : > { %v1096_v39 = vpack.c.bf16 %v751_v37, %v751_v37  ;;  %2536 = vmatprep.subr.bf16.mxu1 %v2953_v1 }
 0x288   : > { %v1146_v40 = vsel %vm869_vm4, %v1096_v39, 0  ;;  %2503 = vmatmul.mubr.msk.bf16.vlgmr.msra.gmra.mxu1 %vm844_vm3, %v3172_v8  ;;  %2667 = vmatprep.subr.msk.bf16.mxu0 %vm869_vm4, %v1096_v39 }
 0x289   : > { %2519 = vmatpush3.bf16.msra.mxu0 %v1146_v40  ;;  %2506 = vmatprep.mubr.msk.bf16.mxu1 %vm844_vm3, %v3175_v11 }
 0x28a   : > { %2556 = vmatprep.subr.bf16.mxu0 %v2953_v1 }
 0x28c   : > { %2521 = vmatmul.mubr.msk.bf16.vlgmr.msra.gmra.mxu0 %vm844_vm3, %v1108_v41 }
 0x28d   : > { %2524 = vmatprep.mubr.msk.bf16.mxu0 %vm844_vm3, %v1110_v42 }
 0x290   : > { %2507 = vmatmul.mubr.msk.bf16.gmra.mxu1 %vm844_vm3, %v3178_v14 }
 0x291   : > { %2510 = vmatprep.mubr.msk.bf16.mxu1 %vm844_vm3, %v3181_v17 }
 0x294   : > { %2525 = vmatmul.mubr.msk.bf16.gmra.mxu0 %vm844_vm3, %v1112_v43 }
 0x295   : > { %2528 = vmatprep.mubr.msk.bf16.mxu0 %vm844_vm3, %v1114_v44 }
 0x298   : > { %2511 = vmatmul.mubr.msk.bf16.gmra.mxu1 %vm844_vm3, %v3184_v20 }
 0x299   : > { %2514 = vmatprep.mubr.msk.bf16.mxu1 %vm844_vm3, %v3187_v23 }
 0x29c   : > { %2529 = vmatmul.mubr.msk.bf16.gmra.mxu0 %vm844_vm3, %v1116_v45 }
 0x29d   : > { %2532 = vmatprep.mubr.msk.bf16.mxu0 %vm844_vm3, %v1118_v46 }
 0x2a0   : > { %2515 = vmatmul.mubr.msk.bf16.gmra.mxu1 %vm844_vm3, %v3190_v24 }
 0x2a1   : > { %2552 = vmatprep.mubr.msk.bf16.mxu1 %vm2954_vm5, %v2953_v1 }
 0x2a4   : > { %2533 = vmatmul.mubr.msk.bf16.gmra.mxu0 %vm844_vm3, %v1120_v47 }
 0x2a5   : > { %2572 = vmatprep.mubr.msk.bf16.mxu0 %vm2954_vm5, %v2953_v1 }
 0x348   : > { %v3266_v48 = vpop.f32.mrf.mxu1 }
 0x34a   : > { %v3268_v49 = vpop.f32.mrf.mxu1 }
 0x34c   : > { %v3270_v50 = vpop.f32.mrf.mxu1  ;;  %v3272_v51 = vpop.f32.mrf.mxu0 }
 0x34e   : > { %v3274_v52 = vpop.f32.mrf.mxu1  ;;  %v3276_v53 = vpop.f32.mrf.mxu0 }
 0x350   : > { %v3278_v54 = vpop.f32.mrf.mxu1  ;;  %v3280_v55 = vpop.f32.mrf.mxu0 }
 0x351   : > { %v972_v12 = vmax.f32 %v3266_v48, %v3278_v54 }
 0x352   : > { %v3282_v56 = vpop.f32.mrf.mxu1  ;;  %v3284_v57 = vpop.f32.mrf.mxu0 }
 0x353   : > { %v970_v16 = vmax.f32 %v3268_v49, %v3282_v56 }
 0x354   : > { %v3286_v58 = vpop.f32.mrf.mxu1  ;;  %v3288_v59 = vpop.f32.mrf.mxu0 }
 0x355   : > { %v973_v17 = vmax.f32 %v3270_v50, %v3286_v58  ;;  %v1247_v18 = vmax.f32 %v3272_v51, %v3288_v59 }
 0x356   : > { %v3290_v61 = vpop.f32.mrf.mxu1  ;;  %v3292_v62 = vpop.f32.mrf.mxu0 }
 0x357   : > { %v971_v20 = vmax.f32 %v3274_v52, %v3290_v61  ;;  %v1245_v39 = vmax.f32 %v3276_v53, %v3292_v62 }
 0x358   : > { %v2512_v63 = vpop.f32.mrf.mxu1  ;;  %v3294_v0 = vpop.f32.mrf.mxu0 }
 0x359   : > { %v3300_v10 = vadd.f32 -1e+30, %v2512_v63  ;;  %v1248_v28 = vmax.f32 %v3280_v55, %v3294_v0 }
 0x35a   : > { %v939_v2 = vpop.f32.mrf.mxu1  ;;  %v3298_v3 = vpop.f32.mrf.mxu0 }
 0x35b   : > { %v3306_v13 = vadd.f32 -1e+30, %v939_v2  ;;  %v976_v27 = vmax.f32 %v972_v12, %v3300_v10  ;;  %v1246_v43 = vmax.f32 %v3284_v57, %v3298_v3 }
 0x35c   : > { %v2513_v4 = vpop.f32.mrf.mxu1  ;;  %v2530_v5 = vpop.f32.mrf.mxu0 }
 0x35d   : > { %v3302_v11 = vadd.f32 -1e+30, %v2513_v4  ;;  %v974_v32 = vmax.f32 %v970_v16, %v3306_v13  ;;  %v3331_v34 = vadd.f32 -1e+30, %v2530_v5 }
 0x35e   : > { %v942_v6 = vpop.f32.mrf.mxu1  ;;  %v1214_v7 = vpop.f32.mrf.mxu0 }
 0x35f   : > { %v3314_v19 = vadd.f32 -1e+30, %v942_v6  ;;  %v977_v29 = vmax.f32 %v973_v17, %v3302_v11  ;;  %v3333_v35 = vadd.f32 -1e+30, %v1214_v7  ;;  %v1251_v6 = vmax.f32 %v1247_v18, %v3331_v34 }
 0x360   : > { %v2516_v8 = vpop.f32.mrf.mxu1  ;;  %v2531_v9 = vpop.f32.mrf.mxu0 }
 0x361   : > { %v3318_v21 = vadd.f32 -1e+30, %v2516_v8  ;;  %v3320_v22 = vadd.f32 -1e+30, %v2531_v9  ;;  %v975_v40 = vmax.f32 %v971_v20, %v3314_v19  ;;  %v1249_v7 = vmax.f32 %v1245_v39, %v3333_v35 }
 0x362   : > { %v955_v14 = vpop.f32.mrf.mxu1  ;;  %v1217_v15 = vpop.f32.mrf.mxu0 }
 0x363   : > { %v3322_v23 = vadd.f32 -1e+30, %v955_v14  ;;  %v3335_v36 = vadd.f32 -1e+30, %v1217_v15  ;;  %v980_v44 = vmax.f32 %v976_v27, %v3318_v21  ;;  %v1252_v45 = vmax.f32 %v1248_v28, %v3320_v22 }
 0x364   : > { %v2517_v24 = vpop.f32.mrf.mxu1  ;;  %v2534_v26 = vpop.f32.mrf.mxu0 }
 0x365   : > { %v3328_v31 = vadd.f32 -1e+30, %v2517_v24  ;;  %v978_v46 = vmax.f32 %v974_v32, %v3322_v23  ;;  %v3348_v63 = vadd.f32 -1e+30, %v2534_v26  ;;  %v1250_v8 = vmax.f32 %v1246_v43, %v3335_v36 }
 0x366   : > { %v958_v37 = vpop.f32.mrf.mxu1  ;;  %v1230_v38 = vpop.f32.mrf.mxu0 }
 0x367   : > { %v981_v41 = vmax.f32 %v977_v29, %v3328_v31  ;;  %v3341_v42 = vadd.f32 -1e+30, %v958_v37  ;;  %v3351_v4 = vadd.f32 -1e+30, %v1230_v38  ;;  %v1255_v17 = vmax.f32 %v1251_v6, %v3348_v63 }
 0x368   : > { %v2535_v47 = vpop.f32.mrf.mxu0 }
 0x369   : > { %v979_v2 = vmax.f32 %v975_v40, %v3341_v42  ;;  %v3353_v5 = vadd.f32 -1e+30, %v2535_v47  ;;  %v983_v12 = vmax.f32 %v980_v44, %v981_v41  ;;  %v1253_v24 = vmax.f32 %v1249_v7, %v3351_v4 }
 0x36a   : > { %v1233_v9 = vpop.f32.mrf.mxu0 }
 0x36b   : > { %v982_v14 = vmax.f32 %v978_v46, %v979_v2  ;;  %v1256_v15 = vmax.f32 %v1252_v45, %v3353_v5  ;;  %v3359_v16 = vadd.f32 -1e+30, %v1233_v9 }
 0x36d   : > { %v984_v20 = vmax.f32 %v982_v14, %v983_v12  ;;  %v1254_v26 = vmax.f32 %v1250_v8, %v3359_v16  ;;  %v1258_v18 = vmax.f32 %v1255_v17, %v1256_v15 }
 0x36f   : > { %v985_v27 = vrot.slane %v984_v20, 4  ;;  %v1257_v28 = vmax.f32 %v1253_v24, %v1254_v26 }
 0x371   : > { %v986_v29 = vmax.f32 %v984_v20, %v985_v27  ;;  %v1259_v32 = vmax.f32 %v1257_v28, %v1258_v18 }
 0x373   : > { %v987_v37 = vrot.slane %v986_v29, 2  ;;  %v1260_v38 = vrot.slane %v1259_v32, 4 }
 0x375   : > { %v988_v39 = vmax.f32 %v986_v29, %v987_v37  ;;  %v1261_v41 = vmax.f32 %v1259_v32, %v1260_v38 }
 0x377   : > { %v989_v40 = vrot.slane %v988_v39, 1  ;;  %v1262_v47 = vrot.slane %v1261_v41, 2 }
 0x379   : > { %v3368_v43 = vmax.f32 %v988_v39, %v989_v40  ;;  %v1263_v12 = vmax.f32 %v1261_v41, %v1262_v47 }
 0x37b   : > { %v991_v44 = vsub.f32 %v3268_v49, %v3368_v43  ;;  %v992_v45 = vsub.f32 %v3274_v52, %v3368_v43  ;;  %v993_v46 = vsub.f32 %v3266_v48, %v3368_v43  ;;  %v994_v2 = vsub.f32 %v3270_v50, %v3368_v43 }
 0x37c   : > { %v995_v8 = vsub.f32 %v3282_v56, %v3368_v43  ;;  %v996_v49 = vsub.f32 %v3290_v61, %v3368_v43  ;;  %v997_v48 = vsub.f32 %v3278_v54, %v3368_v43  ;;  %v1264_v15 = vrot.slane %v1263_v12, 1 }
 0x37d   : > { %v1007_v6 = vmul.f32 1.442695, %v991_v44  ;;  %v1009_v7 = vmul.f32 1.442695, %v992_v45  ;;  %v1011_v9 = vmul.f32 1.442695, %v993_v46  ;;  %v998_v50 = vsub.f32 %v3286_v58, %v3368_v43 }
 0x37e   : > { %v1013_v52 = vmul.f32 1.442695, %v994_v2  ;;  %v1015_v14 = vmul.f32 1.442695, %v995_v8  ;;  %v1017_v17 = vmul.f32 1.442695, %v996_v49  ;;  %v3386_v56 = vmax.f32 %v1263_v12, %v1264_v15 }
 0x37f   : > { %2753 = vpow2.f32 %v1007_v6  ;;  %v999_v20 = vsub.f32 %v3306_v13, %v3368_v43  ;;  %v1000_v61 = vsub.f32 %v3314_v19, %v3368_v43  ;;  %v1019_v24 = vmul.f32 1.442695, %v997_v48 }
 0x380   : > { %2755 = vpow2.f32 %v1009_v7  ;;  %v1266_v54 = vsub.f32 %v3276_v53, %v3386_v56  ;;  %v1021_v26 = vmul.f32 1.442695, %v998_v50  ;;  %v1267_v58 = vsub.f32 %v3284_v57, %v3386_v56 }
 0x381   : > { %2757 = vpow2.f32 %v1011_v9  ;;  %v1001_v27 = vsub.f32 %v3300_v10, %v3368_v43  ;;  %v1023_v18 = vmul.f32 1.442695, %v999_v20  ;;  %v1025_v28 = vmul.f32 1.442695, %v1000_v61 }
 0x382   : > { %2759 = vpow2.f32 %v1013_v52  ;;  %v1268_v13 = vsub.f32 %v3272_v51, %v3386_v56  ;;  %v1002_v19 = vsub.f32 %v3302_v11, %v3368_v43  ;;  %v1282_v29 = vmul.f32 1.442695, %v1266_v54 }
 0x383   : > { %2761 = vpow2.f32 %v1015_v14  ;;  %v1269_v53 = vsub.f32 %v3280_v55, %v3386_v56  ;;  %v1284_v57 = vmul.f32 1.442695, %v1267_v58  ;;  %v1003_v10 = vsub.f32 %v3322_v23, %v3368_v43 }
 0x384   : > { %2763 = vpow2.f32 %v1017_v17  ;;  %v1027_v38 = vmul.f32 1.442695, %v1001_v27  ;;  %v1270_v11 = vsub.f32 %v3292_v62, %v3386_v56  ;;  %v1286_v39 = vmul.f32 1.442695, %v1268_v13 }
 0x385   : > { %2765 = vpow2.f32 %v1019_v24  ;;  %v1004_v55 = vsub.f32 %v3341_v42, %v3368_v43  ;;  %v1029_v41 = vmul.f32 1.442695, %v1002_v19  ;;  %v1271_v23 = vsub.f32 %v3298_v3, %v3386_v56 }
 0x386   : > { %2767 = vpow2.f32 %v1021_v26  ;;  %v1288_v45 = vmul.f32 1.442695, %v1269_v53  ;;  %v1005_v62 = vsub.f32 %v3318_v21, %v3368_v43  ;;  %v1031_v47 = vmul.f32 1.442695, %v1003_v10 }
 0x387   : > { %2769 = vpow2.f32 %v1023_v18  ;;  %v1272_v42 = vsub.f32 %v3288_v59, %v3386_v56  ;;  %v1290_v6 = vmul.f32 1.442695, %v1270_v11  ;;  %v1006_v3 = vsub.f32 %v3328_v31, %v3368_v43 }
 0x388   : > { %2771 = vpow2.f32 %v1025_v28  ;;  %v1033_v8 = vmul.f32 1.442695, %v1004_v55  ;;  %v1273_v21 = vsub.f32 %v3294_v0, %v3386_v56  ;;  %v1292_v12 = vmul.f32 1.442695, %v1271_v23 }
 0x389   : > { %2773 = vpow2.f32 %v1282_v29  ;;  %v1035_v59 = vmul.f32 1.442695, %v1005_v62  ;;  %v1274_v48 = vsub.f32 %v3333_v35, %v3386_v56  ;;  %v1294_v31 = vmul.f32 1.442695, %v1272_v42 }
 0x38a   : > { %2775 = vpow2.f32 %v1284_v57  ;;  %v1037_v14 = vmul.f32 1.442695, %v1006_v3  ;;  %v1275_v0 = vsub.f32 %v3335_v36, %v3386_v56  ;;  %v1296_v50 = vmul.f32 1.442695, %v1273_v21 }
 0x38b   : > { %2777 = vpow2.f32 %v1027_v38  ;;  %v1276_v61 = vsub.f32 %v3331_v34, %v3386_v56  ;;  %v1298_v24 = vmul.f32 1.442695, %v1274_v48  ;;  %v1277_v58 = vsub.f32 %v3320_v22, %v3386_v56 }
 0x38c   : > { %v3402_v32 = vpop.eup %2753  ;;  %2779 = vpow2.f32 %v1286_v39  ;;  %v1300_v27 = vmul.f32 1.442695, %v1275_v0  ;;  %v1278_v28 = vsub.f32 %v3351_v4, %v3386_v56  ;;  %v1279_v22 = vsub.f32 %v3359_v16, %v3386_v56 }
 0x38d   : > { %v3406_v37 = vpop.eup %2755  ;;  %2781 = vpow2.f32 %v1029_v41  ;;  %v1302_v19 = vmul.f32 1.442695, %v1276_v61  ;;  %v1304_v4 = vmul.f32 1.442695, %v1277_v58  ;;  %v1280_v11 = vsub.f32 %v3348_v63, %v3386_v56 }
 0x38e   : > { %v1039_v51 = vadd.f32 %v3406_v37, %v3402_v32  ;;  %v3414_v40 = vpop.eup %2757  ;;  %2783 = vpow2.f32 %v1288_v45  ;;  %v1306_v41 = vmul.f32 1.442695, %v1278_v28  ;;  %v1281_v23 = vsub.f32 %v3353_v5, %v3386_v56 }
 0x38f   : > { %v3421_v46 = vpop.eup %2759  ;;  %2785 = vpow2.f32 %v1031_v47  ;;  %v1308_v47 = vmul.f32 1.442695, %v1279_v22  ;;  %v1310_v3 = vmul.f32 1.442695, %v1280_v11  ;;  %v1067_v11 = vlaneseq }
 0x390   : > { %v1040_v44 = vadd.f32 %v3414_v40, %v1039_v51  ;;  %v3428_v7 = vpop.eup %2761  ;;  %2787 = vpow2.f32 %v1290_v6  ;;  %v1312_v5 = vmul.f32 1.442695, %v1281_v23 }
 0x391   : > { %v3435_v49 = vpop.eup %2763  ;;  %2789 = vpow2.f32 %v1033_v8  ;;  %v1068_v23 = vshrl.u32 %v1067_v11, 7 }
 0x392   : > { %v1041_v2 = vadd.f32 %v3421_v46, %v1040_v44  ;;  %v3440_v43 = vpop.eup %2765  ;;  %2791 = vpow2.f32 %v1292_v12 }
 0x393   : > { %v3445_v17 = vpop.eup %2767  ;;  %2793 = vpow2.f32 %v1035_v59 }
 0x394   : > { %v1042_v9 = vadd.f32 %v3428_v7, %v1041_v2  ;;  %v3447_v20 = vpop.eup %2769  ;;  %2795 = vpow2.f32 %v1294_v31 }
 0x395   : > { %v3452_v54 = vpop.eup %2771  ;;  %2797 = vpow2.f32 %v1037_v14 }
 0x396   : > { %v1043_v52 = vadd.f32 %v3435_v49, %v1042_v9  ;;  %v3454_v26 = vpop.eup %2773  ;;  %2799 = vpow2.f32 %v1296_v50 }
 0x397   : > { %v3459_v18 = vpop.eup %2775  ;;  %2801 = vpow2.f32 %v1298_v24 }
 0x398   : > { %v1044_v15 = vadd.f32 %v3440_v43, %v1043_v52  ;;  %v3463_v34 = vpop.eup %2777  ;;  %v1314_v29 = vadd.f32 %v3459_v18, %v3454_v26  ;;  %2803 = vpow2.f32 %v1300_v27 }
 0x399   : > { %v3468_v53 = vpop.eup %2779  ;;  %2805 = vpow2.f32 %v1302_v19 }
 0x39a   : > { %v1045_v35 = vadd.f32 %v3445_v17, %v1044_v15  ;;  %v3472_v57 = vpop.eup %2781  ;;  %v1315_v38 = vadd.f32 %v3468_v53, %v1314_v29  ;;  %2807 = vpow2.f32 %v1304_v4 }
 0x39b   : > { %v3476_v51 = vpop.eup %2783  ;;  %2809 = vpow2.f32 %v1306_v41 }
 0x39c   : > { %v1046_v36 = vadd.f32 %v3447_v20, %v1045_v35  ;;  %v3480_v39 = vpop.eup %2785  ;;  %v1316_v16 = vadd.f32 %v3476_v51, %v1315_v38  ;;  %2811 = vpow2.f32 %v1308_v47 }
 0x39d   : > { %v3484_v44 = vpop.eup %2787  ;;  %2813 = vpow2.f32 %v1310_v3 }
 0x39e   : > { %v1047_v13 = vadd.f32 %v3452_v54, %v1046_v36  ;;  %v2790_v45 = vpop.eup %2789  ;;  %v1317_v63 = vadd.f32 %v3484_v44, %v1316_v16  ;;  %2815 = vpow2.f32 %v1312_v5 }
 0x39f   : > { %v3490_v2 = vpop.eup %2791 }
 0x3a0   : > { %v1048_v10 = vadd.f32 %v3463_v34, %v1047_v13  ;;  %v2794_v42 = vpop.eup %2793  ;;  %v1318_v8 = vadd.f32 %v3490_v2, %v1317_v63  ;;  %v3514_v63 = vsub.s32 0, %v1068_v23 }
 0x3a1   : > { %v3493_v9 = vpop.eup %2795 }
 0x3a2   : > { %v1049_v55 = vadd.f32 %v3472_v57, %v1048_v10  ;;  %v2798_v21 = vpop.eup %2797  ;;  %v1319_v56 = vadd.f32 %v3493_v9, %v1318_v8  ;;  %v1065_v8 = vpop.permute.xlu0 %1064 }
 0x3a3   : > { %v3496_v59 = vpop.eup %2799 }
 0x3a4   : > { %v1050_v62 = vadd.f32 %v3480_v39, %v1049_v55  ;;  %v1320_v48 = vadd.f32 %v3496_v59, %v1319_v56  ;;  %v3499_v31 = vpop.eup %2801 }
 0x3a5   : > { %v3502_v0 = vpop.eup %2803 }
 0x3a6   : > { %v1051_v6 = vadd.f32 %v2790_v45, %v1050_v62  ;;  %v1321_v15 = vadd.f32 %v3499_v31, %v1320_v48  ;;  %v3505_v61 = vpop.eup %2805 }
 0x3a7   : > { %v3508_v58 = vpop.eup %2807 }
 0x3a8   : > { %v1052_v12 = vadd.f32 %v2794_v42, %v1051_v6  ;;  %v1322_v35 = vadd.f32 %v3502_v0, %v1321_v15  ;;  %v2810_v13 = vpop.eup %2809 }
 0x3a9   : > { %v3511_v22 = vpop.eup %2811 }
 0x3aa   : > { %v1053_v52 = vadd.f32 %v2798_v21, %v1052_v12  ;;  %v1323_v36 = vadd.f32 %v3505_v61, %v1322_v35  ;;  %v2814_v38 = vpop.eup %2813  ;;  %v1070_v12 = vrot.slane %v1065_v8, %v3514_v63 }
 0x3ab   : > { %v2816_v41 = vpop.eup %2815 }
 0x3ac   : > { %v1054_v14 = vrot.slane %v1053_v52, 4  ;;  %v1324_v28 = vadd.f32 %v3508_v58, %v1323_v36 }
 0x3ae   : > { %v1055_v50 = vadd.f32 %v1054_v14, %v1053_v52  ;;  %v1325_v29 = vadd.f32 %v2810_v13, %v1324_v28 }
 0x3b0   : > { %v1056_v24 = vrot.slane %v1055_v50, 2  ;;  %v1326_v4 = vadd.f32 %v3511_v22, %v1325_v29 }
 0x3b2   : > { %v1057_v27 = vadd.f32 %v1056_v24, %v1055_v50  ;;  %v1327_v55 = vadd.f32 %v2814_v38, %v1326_v4 }
 0x3b4   : > { %v1058_v19 = vrot.slane %v1057_v27, 1  ;;  %v1328_v16 = vadd.f32 %v2816_v41, %v1327_v55 }
 0x3b6   : > { %v1059_v10 = vadd.f32 %v1058_v19, %v1057_v27  ;;  %v1329_v62 = vrot.slane %v1328_v16, 4 }
 0x3b8   : > { %2817 = vrcp.f32 %v1059_v10  ;;  %v1330_v47 = vadd.f32 %v1329_v62, %v1328_v16 }
 0x3ba   : > { %v1331_v6 = vrot.slane %v1330_v47, 2 }
 0x3bc   : > { %v1332_v3 = vadd.f32 %v1331_v6, %v1330_v47 }
 0x3be   : > { %v1333_v5 = vrot.slane %v1332_v3, 1 }
 0x3c0   : > { %v1334_v48 = vadd.f32 %v1333_v5, %v1332_v3 }
 0x3c2   : > { %2819 = vrcp.f32 %v1334_v48 }
 0x3c5   : > { %v2818_v56 = vpop.eup %2817 }
 0x3c6   : > { %v1071_v52 = vmul.f32 %v2818_v56, %v1070_v12 }
 0x3c8   : > { %v1086_v14 = vmul.f32 %v2794_v42, %v1071_v52  ;;  %v1087_v15 = vmul.f32 %v2798_v21, %v1071_v52  ;;  %v1084_v50 = vmul.f32 %v3480_v39, %v1071_v52  ;;  %v1085_v35 = vmul.f32 %v2790_v45, %v1071_v52 }
 0x3c9   : > { %v1080_v24 = vmul.f32 %v3447_v20, %v1071_v52  ;;  %v1081_v27 = vmul.f32 %v3452_v54, %v1071_v52  ;;  %v1078_v28 = vmul.f32 %v3440_v43, %v1071_v52  ;;  %v1079_v19 = vmul.f32 %v3445_v17, %v1071_v52 }
 0x3ca   : > { %v1095_v36 = vpack.c.bf16 %v1087_v15, %v1086_v14  ;;  %v1076_v29 = vmul.f32 %v3428_v7, %v1071_v52  ;;  %v1077_v10 = vmul.f32 %v3435_v49, %v1071_v52  ;;  %v1074_v21 = vmul.f32 %v3414_v40, %v1071_v52  ;;  %v1339_v40 = vpop.permute.xlu1 %1338 }
 0x3cb   : > { %v1092_v4 = vpack.c.bf16 %v1081_v27, %v1080_v24  ;;  %v1091_v42 = vpack.c.bf16 %v1079_v19, %v1078_v28  ;;  %v1075_v39 = vmul.f32 %v3421_v46, %v1071_v52  ;;  %v3528_v54 = vmul.f32 %v3402_v32, %v1071_v52 }
 0x3cc   : > { %2557 = vmatpush3.bf16.msra.mxu0 %v1095_v36  ;;  %v1090_v20 = vpack.c.bf16 %v1077_v10, %v1076_v29  ;;  %v1073_v43 = vmul.f32 %v3406_v37, %v1071_v52  ;;  %v1094_v17 = vpack.c.bf16 %v1085_v35, %v1084_v50  ;;  %v1082_v7 = vmul.f32 %v3463_v34, %v1071_v52  ;;  %v689_v50 = vpop.permute.xlu0 %688 }
 0x3cd   : > { %2558 = vmatprep.subr.bf16.mxu0 %v2953_v1  ;;  %v1083_v49 = vmul.f32 %v3472_v57, %v1071_v52  ;;  %v1089_v45 = vpack.c.bf16 %v1075_v39, %v1074_v21  ;;  %v1344_v46 = vrot.slane %v1339_v40, %v3514_v63  ;;  %v756_v27 = vadd.f32 %v3213_v30, %v689_v50 }
 0x3ce   : > { %v1088_v11 = vpack.c.bf16 %v1073_v43, %v3528_v54  ;;  %v694_v47 = vpop.permute.xlu1 %693 }
 0x3cf   : > { %v1093_v55 = vpack.c.bf16 %v1083_v49, %v1082_v7  ;;  %v2820_v32 = vpop.eup %2819  ;;  %v1455_v29 = vpack.c.bf16 %v756_v27, %v756_v27  ;;  %v2955_v7 = vmov 3   ;;  %v2956_v49 = vmov 2  }
 0x3d0   : > { %2559 = vmatpush3.bf16.msra.mxu0 %v1094_v17  ;;  %v1345_v37 = vmul.f32 %v2820_v32, %v1344_v46  ;;  %v1457_v24 = vpop.permute.xlu0 %1456  ;;  %2748 = vset.pattern.permute.xlu1 %v2955_v7 }
 0x3d1   : > { %2560 = vmatprep.subr.bf16.mxu0 %v2953_v1  ;;  %1955 = vperm.xlu1 %2748, %v3198_v25  }
 0x3d2   : > { %v1360_v16 = vmul.f32 %v2814_v38, %v1345_v37  ;;  %v1361_v23 = vmul.f32 %v2816_v41, %v1345_v37  ;;  %v1358_v34 = vmul.f32 %v2810_v13, %v1345_v37  ;;  %v1354_v57 = vmul.f32 %v3499_v31, %v1345_v37  ;;  %v1723_v48 = vpop.permute.xlu1 %1722  ;;  %2747 = vset.pattern.permute.xlu0 %v2956_v49 }
 0x3d3   : > { %v1355_v62 = vmul.f32 %v3502_v0, %v1345_v37  ;;  %v1359_v3 = vmul.f32 %v3511_v22, %v1345_v37  ;;  %v1352_v8 = vmul.f32 %v3493_v9, %v1345_v37  ;;  %v1353_v12 = vmul.f32 %v3496_v59, %v1345_v37  ;;  %1689 = vperm.xlu0 %2747, %v3198_v25  }
 0x3d4   : > { %2561 = vmatpush3.bf16.msra.mxu0 %v1093_v55  ;;  %v1369_v6 = vpack.c.bf16 %v1361_v23, %v1360_v16  ;;  %v1350_v38 = vmul.f32 %v3484_v44, %v1345_v37  ;;  %v1351_v41 = vmul.f32 %v3490_v2, %v1345_v37  ;;  %v1348_v31 = vmul.f32 %v3468_v53, %v1345_v37  ;;  %v1459_v28 = vpop.permute.xlu0 %1458 }
 0x3d5   : > { %2562 = vmatprep.subr.bf16.mxu0 %v2953_v1  ;;  %v1366_v5 = vpack.c.bf16 %v1355_v62, %v1354_v57  ;;  %v1365_v13 = vpack.c.bf16 %v1353_v12, %v1352_v8  ;;  %v1349_v0 = vmul.f32 %v3476_v51, %v1345_v37  ;;  %v1346_v9 = vmul.f32 %v3454_v26, %v1345_v37  ;;  %v778_v26 = vld [vmem:[#allocation3 + $0x10] sm:$0xff] }
 0x3d6   : > { %2537 = vmatpush3.bf16.msra.mxu1 %v1369_v6  ;;  %v1364_v22 = vpack.c.bf16 %v1351_v41, %v1350_v38  ;;  %v1347_v59 = vmul.f32 %v3459_v18, %v1345_v37  ;;  %v1368_v56 = vpack.c.bf16 %v1359_v3, %v1358_v34  ;;  %v1356_v44 = vmul.f32 %v3505_v61, %v1345_v37  ;;  %v779_v18 = vld [vmem:[#allocation3] sm:$0xff]  ;;  %v1725_v15 = vpop.permute.xlu1 %1724 }
 0x3d7   : > { %2538 = vmatprep.subr.bf16.mxu1 %v2953_v1  ;;  %v1357_v2 = vmul.f32 %v3508_v58, %v1345_v37  ;;  %v1363_v52 = vpack.c.bf16 %v1349_v0, %v1348_v31  ;;  %v759_v51 = vadd.f32 %v3215_v33, %v694_v47  ;;  %v834_v58 = vpack.c.bf16 %v779_v18, %v778_v26 }
 0x3d8   : > { %2563 = vmatpush3.bf16.msra.mxu0 %v1092_v4  ;;  %v1362_v14 = vpack.c.bf16 %v1347_v59, %v1346_v9  ;;  %v1461_v10 = vpop.permute.xlu0 %1460  ;;  %v1497_v4 = vsel %vm869_vm4, %v1455_v29, 0  ;;  %2750 = vset.pattern.permute.xlu1 %v2948_v60 }
 0x3d9   : > { %2564 = vmatprep.subr.bf16.mxu0 %v2953_v1  ;;  %v1367_v53 = vpack.c.bf16 %v1357_v2, %v1356_v44  ;;  %v1721_v61 = vpack.c.bf16 %v759_v51, %v759_v51  ;;  %2749 = vset.pattern.permute.xlu0 %v2948_v60 }
 0x3da   : > { %2539 = vmatpush3.bf16.msra.mxu1 %v1368_v56  ;;  %v1727_v35 = vpop.permute.xlu1 %1726 }
 0x3db   : > { %2540 = vmatprep.subr.bf16.mxu1 %v2953_v1  ;;  %v1763_v33 = vsel %vm869_vm4, %v1721_v61, 0 }
 0x3dc   : > { %2565 = vmatpush3.bf16.msra.mxu0 %v1091_v42  ;;  %v1463_v42 = vpop.permute.xlu0 %1462 }
 0x3dd   : > { %2566 = vmatprep.subr.bf16.mxu0 %v2953_v1 }
 0x3de   : > { %2541 = vmatpush3.bf16.msra.mxu1 %v1367_v53  ;;  %v1729_v36 = vpop.permute.xlu1 %1728 }
 0x3df   : > { %2542 = vmatprep.subr.bf16.mxu1 %v2953_v1 }
 0x3e0   : > { %2567 = vmatpush3.bf16.msra.mxu0 %v1090_v20  ;;  %v1465_v39 = vpop.permute.xlu0 %1464 }
 0x3e1   : > { %2568 = vmatprep.subr.bf16.mxu0 %v2953_v1 }
 0x3e2   : > { %2543 = vmatpush3.bf16.msra.mxu1 %v1366_v5  ;;  %v1731_v19 = vpop.permute.xlu1 %1730 }
 0x3e3   : > { %2544 = vmatprep.subr.bf16.mxu1 %v2953_v1 }
 0x3e4   : > { %2569 = vmatpush3.bf16.msra.mxu0 %v1089_v45  ;;  %v1467_v54 = vpop.permute.xlu0 %1466 }
 0x3e5   : > { %2570 = vmatprep.subr.bf16.mxu0 %v2953_v1 }
 0x3e6   : > { %2545 = vmatpush3.bf16.msra.mxu1 %v1365_v13  ;;  %v1733_v30 = vpop.permute.xlu1 %1732 }
 0x3e7   : > { %2546 = vmatprep.subr.bf16.mxu1 %v2953_v1 }
 0x3e8   : > { %2571 = vmatpush3.bf16.msra.mxu0 %v1088_v11  ;;  %v1469_v43 = vpop.permute.xlu0 %1468 }
 0x3e9   : > { %2669 = vmatprep.subr.msk.bf16.mxu0 %vm869_vm4, %v1721_v61 }
 0x3ea   : > { %2547 = vmatpush3.bf16.msra.mxu1 %v1364_v22  ;;  %v1735_v21 = vpop.permute.xlu1 %1734 }
 0x3eb   : > { %2573 = vmatmul.mubr.bf16.vlgmr.msra.gmra.mxu0 %v834_v58  ;;  %2548 = vmatprep.subr.bf16.mxu1 %v2953_v1 }
 0x3ec   : > { %2595 = vmatpush3.bf16.msra.mxu0 %v1763_v33  ;;  %2596 = vmatprep.mubr.msk.bf16.mxu0 %vm844_vm3, %v1723_v48  ;;  %v1471_v17 = vpop.permute.xlu0 %1470 }
 0x3ed   : > { %2632 = vmatprep.subr.bf16.mxu0 %v2953_v1 }
 0x3ee   : > { %2549 = vmatpush3.bf16.msra.mxu1 %v1363_v52  ;;  %v1737_v20 = vpop.permute.xlu1 %1736 }
 0x3ef   : > { %2550 = vmatprep.subr.bf16.mxu1 %v2953_v1 }
 0x3f2   : > { %2551 = vmatpush3.bf16.msra.mxu1 %v1362_v14 }
 0x3f3   : > { %2597 = vmatmul.mubr.msk.bf16.vlgmr.msra.gmra.mxu0 %vm844_vm3, %v1725_v15  ;;  %2668 = vmatprep.subr.msk.bf16.mxu1 %vm869_vm4, %v1455_v29 }
 0x3f4   : > { %2600 = vmatprep.mubr.msk.bf16.mxu0 %vm844_vm3, %v1727_v35 }
 0x3f5   : > { %2553 = vmatmul.mubr.bf16.vlgmr.msra.gmra.mxu1 %v834_v58 }
 0x3f6   : > { %2577 = vmatpush3.bf16.msra.mxu1 %v1497_v4  ;;  %2578 = vmatprep.mubr.msk.bf16.mxu1 %vm844_vm3, %v1457_v24 }
 0x3f7   : > { %2612 = vmatprep.subr.bf16.mxu1 %v2953_v1 }
 0x3fb   : > { %2601 = vmatmul.mubr.msk.bf16.gmra.mxu0 %vm844_vm3, %v1729_v36 }
 0x3fc   : > { %2604 = vmatprep.mubr.msk.bf16.mxu0 %vm844_vm3, %v1731_v19 }
 0x3fd   : > { %2579 = vmatmul.mubr.msk.bf16.vlgmr.msra.gmra.mxu1 %vm844_vm3, %v1459_v28 }
 0x3fe   : > { %2582 = vmatprep.mubr.msk.bf16.mxu1 %vm844_vm3, %v1461_v10 }
 0x403   : > { %2605 = vmatmul.mubr.msk.bf16.gmra.mxu0 %vm844_vm3, %v1733_v30 }
 0x404   : > { %2608 = vmatprep.mubr.msk.bf16.mxu0 %vm844_vm3, %v1735_v21 }
 0x405   : > { %2583 = vmatmul.mubr.msk.bf16.gmra.mxu1 %vm844_vm3, %v1463_v42 }
 0x406   : > { %2586 = vmatprep.mubr.msk.bf16.mxu1 %vm844_vm3, %v1465_v39 }
 0x40b   : > { %2609 = vmatmul.mubr.msk.bf16.gmra.mxu0 %vm844_vm3, %v1737_v20 }
 0x40c   : > { %2648 = vmatprep.mubr.msk.bf16.mxu0 %vm2954_vm5, %v2953_v1 }
 0x40d   : > { %2587 = vmatmul.mubr.msk.bf16.gmra.mxu1 %vm844_vm3, %v1467_v54 }
 0x40e   : > { %2590 = vmatprep.mubr.msk.bf16.mxu1 %vm844_vm3, %v1469_v43 }
 0x415   : > { %2591 = vmatmul.mubr.msk.bf16.gmra.mxu1 %vm844_vm3, %v1471_v17 }
 0x416   : > { %2628 = vmatprep.mubr.msk.bf16.mxu1 %vm2954_vm5, %v2953_v1 }
 0x4ab   : > { %v1445_v45 = vpop.f32.mrf.mxu0 }
 0x4ad   : > { %v2574_v11 = vpop.f32.mrf.mxu0 }
 0x4af   : > { %v1448_v40 = vpop.f32.mrf.mxu0 }
 0x4b1   : > { %v2575_v46 = vpop.f32.mrf.mxu0 }
 0x4b3   : > { %v3593_v55 = vpop.f32.mrf.mxu0 }
 0x4b5   : > { %v3595_v32 = vpop.f32.mrf.mxu0  ;;  %v1404_v23 = vpop.f32.mrf.mxu1 }
 0x4b6   : > { %v3603_v57 = vadd.f32 %v1445_v45, %v1404_v23 }
 0x4b7   : > { %v3597_v37 = vpop.f32.mrf.mxu0  ;;  %v2554_v25 = vpop.f32.mrf.mxu1 }
 0x4b9   : > { %v3599_v16 = vpop.f32.mrf.mxu0  ;;  %v1407_v60 = vpop.f32.mrf.mxu1 }
 0x4ba   : > { %v3609_v6 = vadd.f32 %v1448_v40, %v1407_v60 }
 0x4bb   : > { %v3601_v34 = vpop.f32.mrf.mxu0  ;;  %v2555_v3 = vpop.f32.mrf.mxu1 }
 0x4bc   : > { %v1453_v12 = vpack.c.bf16 %v3609_v6, %v3603_v57  ;;  %v1864_v26 = vmax.f32 %v3593_v55, %v3601_v34  ;;  %v2175_v57 = vld [vmem:[%s3960_s9] sm:$0xff] }
 0x4bd   : > { %v3605_v62 = vpop.f32.mrf.mxu0  ;;  %v3615_v5 = vpop.f32.mrf.mxu1 }
 0x4be   : > { %v1862_v18 = vmax.f32 %v3595_v32, %v3605_v62 }
 0x4bf   : > { %v3607_v47 = vpop.f32.mrf.mxu0  ;;  %v3617_v41 = vpop.f32.mrf.mxu1 }
 0x4c0   : > { %v1865_v14 = vmax.f32 %v3597_v37, %v3607_v47 }
 0x4c1   : > { %v3611_v8 = vpop.f32.mrf.mxu0  ;;  %v3619_v31 = vpop.f32.mrf.mxu1 }
 0x4c2   : > { %v1863_v15 = vmax.f32 %v3599_v16, %v3611_v8 }
 0x4c3   : > { %v2606_v38 = vpop.f32.mrf.mxu0  ;;  %v3621_v22 = vpop.f32.mrf.mxu1 }
 0x4c4   : > { %v3629_v52 = vadd.f32 -1e+30, %v2606_v38 }
 0x4c5   : > { %v1831_v13 = vpop.f32.mrf.mxu0  ;;  %v3623_v59 = vpop.f32.mrf.mxu1 }
 0x4c6   : > { %v3633_v53 = vadd.f32 -1e+30, %v1831_v13  ;;  %v1868_v36 = vmax.f32 %v1864_v26, %v3629_v52 }
 0x4c7   : > { %v2607_v0 = vpop.f32.mrf.mxu0  ;;  %v3627_v2 = vpop.f32.mrf.mxu1 }
 0x4c8   : > { %v3625_v44 = vadd.f32 -1e+30, %v2607_v0  ;;  %v1866_v19 = vmax.f32 %v1862_v18, %v3633_v53 }
 0x4c9   : > { %v1834_v9 = vpop.f32.mrf.mxu0  ;;  %v3643_v61 = vpop.f32.mrf.mxu1 }
 0x4ca   : > { %v3635_v51 = vadd.f32 -1e+30, %v1834_v9  ;;  %v1869_v50 = vmax.f32 %v1865_v14, %v3625_v44  ;;  %v1596_v14 = vmax.f32 %v3617_v41, %v3627_v2  ;;  %v1599_v26 = vmax.f32 %v3619_v31, %v3643_v61 }
 0x4cb   : > { %v2610_v56 = vpop.f32.mrf.mxu0  ;;  %v3653_v27 = vpop.f32.mrf.mxu1 }
 0x4cc   : > { %v3646_v35 = vadd.f32 -1e+30, %v2610_v56  ;;  %v1867_v29 = vmax.f32 %v1863_v15, %v3635_v51  ;;  %v1597_v9 = vmax.f32 %v3621_v22, %v3653_v27 }
 0x4cd   : > { %v1847_v48 = vpop.f32.mrf.mxu0  ;;  %v2588_v30 = vpop.f32.mrf.mxu1 }
 0x4ce   : > { %v3648_v33 = vadd.f32 -1e+30, %v1847_v48  ;;  %v1872_v42 = vmax.f32 %v1868_v36, %v3646_v35  ;;  %v3679_v15 = vadd.f32 -1e+30, %v2588_v30 }
 0x4cf   : > { %v2611_v58 = vpop.f32.mrf.mxu0  ;;  %v1565_v20 = vpop.f32.mrf.mxu1 }
 0x4d0   : > { %v3650_v24 = vadd.f32 -1e+30, %v2611_v58  ;;  %v1870_v21 = vmax.f32 %v1866_v19, %v3648_v33  ;;  %v3665_v13 = vadd.f32 -1e+30, %v1565_v20 }
 0x4d1   : > { %v1850_v28 = vpop.f32.mrf.mxu0  ;;  %v2589_v17 = vpop.f32.mrf.mxu1 }
 0x4d2   : > { %v1873_v10 = vmax.f32 %v1869_v50, %v3650_v24  ;;  %v3658_v4 = vadd.f32 -1e+30, %v1850_v28  ;;  %v3669_v56 = vadd.f32 -1e+30, %v2589_v17  ;;  %v1598_v28 = vmax.f32 %v3615_v5, %v3623_v59 }
 0x4d3   : > { %v1568_v49 = vpop.f32.mrf.mxu1  ;;  %v1600_v19 = vmax.f32 %v1596_v14, %v3665_v13 }
 0x4d4   : > { %v1871_v39 = vmax.f32 %v1867_v29, %v3658_v4  ;;  %v1875_v54 = vmax.f32 %v1872_v42, %v1873_v10  ;;  %v3663_v3 = vadd.f32 -1e+30, %v1568_v49  ;;  %v1603_v30 = vmax.f32 %v1599_v26, %v3669_v56 }
 0x4d5   : > { %v2592_v11 = vpop.f32.mrf.mxu1  ;;  %v1602_v20 = vmax.f32 %v1598_v28, %v3679_v15 }
 0x4d6   : > { %v1874_v43 = vmax.f32 %v1870_v21, %v1871_v39  ;;  %v1601_v58 = vmax.f32 %v1597_v9, %v3663_v3  ;;  %v3694_v42 = vadd.f32 -1e+30, %v2592_v11 }
 0x4d7   : > { %v1581_v46 = vpop.f32.mrf.mxu1 }
 0x4d8   : > { %v1876_v7 = vmax.f32 %v1874_v43, %v1875_v54  ;;  %v3682_v50 = vadd.f32 -1e+30, %v1581_v46 }
 0x4d9   : > { %v2593_v25 = vpop.f32.mrf.mxu1 }
 0x4da   : > { %v1877_v45 = vrot.slane %v1876_v7, 4  ;;  %v3684_v36 = vadd.f32 -1e+30, %v2593_v25  ;;  %v1604_v54 = vmax.f32 %v1600_v19, %v3682_v50 }
 0x4db   : > { %v1584_v38 = vpop.f32.mrf.mxu1 }
 0x4dc   : > { %v1878_v40 = vmax.f32 %v1876_v7, %v1877_v45  ;;  %v3671_v48 = vadd.f32 -1e+30, %v1584_v38  ;;  %v1606_v7 = vmax.f32 %v1602_v20, %v3694_v42 }
 0x4de   : > { %v1879_v23 = vrot.slane %v1878_v40, 2  ;;  %v1605_v39 = vmax.f32 %v1601_v58, %v3671_v48 }
 0x4e0   : > { %v1880_v60 = vmax.f32 %v1878_v40, %v1879_v23 }
 0x4e2   : > { %v1881_v0 = vrot.slane %v1880_v60, 1 }
 0x4e4   : > { %v3677_v18 = vmax.f32 %v1880_v60, %v1881_v0 }
 0x4e6   : > { %v1883_v29 = vsub.f32 %v3595_v32, %v3677_v18  ;;  %v1884_v10 = vsub.f32 %v3599_v16, %v3677_v18  ;;  %v1885_v21 = vsub.f32 %v3593_v55, %v3677_v18  ;;  %v1886_v43 = vsub.f32 %v3597_v37, %v3677_v18 }
 0x4e7   : > { %v1607_v32 = vmax.f32 %v1603_v30, %v3684_v36  ;;  %v1887_v49 = vsub.f32 %v3605_v62, %v3677_v18  ;;  %v1608_v55 = vmax.f32 %v1604_v54, %v1605_v39  ;;  %v1888_v11 = vsub.f32 %v3611_v8, %v3677_v18  ;;  %v782_v62 = vld [vmem:[%s3958_s7] sm:$0xff]  ;;  %v783_v8 = vld [vmem:[%s3958_s7 + $0x8] sm:$0xff] }
 0x4e8   : > { %v1899_v17 = vmul.f32 1.442695, %v1883_v29  ;;  %v1901_v16 = vmul.f32 1.442695, %v1884_v10  ;;  %v1903_v45 = vmul.f32 1.442695, %v1885_v21  ;;  %v1889_v37 = vsub.f32 %v3601_v34, %v3677_v18 }
 0x4e9   : > { %v1905_v40 = vmul.f32 1.442695, %v1886_v43  ;;  %v1609_v46 = vmax.f32 %v1606_v7, %v1607_v32  ;;  %v1907_v23 = vmul.f32 1.442695, %v1887_v49  ;;  %v1890_v60 = vsub.f32 %v3607_v47, %v3677_v18 }
 0x4ea   : > { %2821 = vpow2.f32 %v1899_v17  ;;  %v1909_v38 = vmul.f32 1.442695, %v1888_v11  ;;  %v3719_v9 = vpack.c.bf16 %v783_v8, %v782_v62  ;;  %v1891_v34 = vsub.f32 %v3633_v53, %v3677_v18 }
 0x4eb   : > { %2823 = vpow2.f32 %v1901_v16  ;;  %v1610_v25 = vmax.f32 %v1608_v55, %v1609_v46  ;;  %v1911_v14 = vmul.f32 1.442695, %v1889_v37  ;;  %v1892_v47 = vsub.f32 %v3635_v51, %v3677_v18 }
 0x4ec   : > { %2825 = vpow2.f32 %v1903_v45  ;;  %2071 = vrot.lane.b32.xlu1 %v3719_v9, %s2952_s26  ;;  %v1913_v58 = vmul.f32 1.442695, %v1890_v60  ;;  %v1893_v19 = vsub.f32 %v3629_v52, %v3677_v18  ;;  %v1915_v29 = vmul.f32 1.442695, %v1891_v34 }
 0x4ed   : > { %2827 = vpow2.f32 %v1905_v40  ;;  %v1611_v0 = vrot.slane %v1610_v25, 4  ;;  %v1894_v53 = vsub.f32 %v3625_v44, %v3677_v18  ;;  %v1917_v21 = vmul.f32 1.442695, %v1892_v47 }
 0x4ee   : > { %2829 = vpow2.f32 %v1907_v23  ;;  %v1895_v51 = vsub.f32 %v3648_v33, %v3677_v18  ;;  %v1919_v54 = vmul.f32 1.442695, %v1893_v19  ;;  %v1896_v44 = vsub.f32 %v3658_v4, %v3677_v18 }
 0x4ef   : > { %v1612_v26 = vmax.f32 %v1610_v25, %v1611_v0  ;;  %2831 = vpow2.f32 %v1909_v38  ;;  %v1921_v17 = vmul.f32 1.442695, %v1894_v53  ;;  %v1897_v11 = vsub.f32 %v3646_v35, %v3677_v18 }
 0x4f0   : > { %2833 = vpow2.f32 %v1911_v14  ;;  %v1923_v49 = vmul.f32 1.442695, %v1895_v51  ;;  %v1925_v37 = vmul.f32 1.442695, %v1896_v44 }
 0x4f1   : > { %v1613_v28 = vrot.slane %v1612_v26, 2  ;;  %2835 = vpow2.f32 %v1913_v58  ;;  %v1927_v62 = vmul.f32 1.442695, %v1897_v11 }
 0x4f2   : > { %2837 = vpow2.f32 %v1915_v29 }
 0x4f3   : > { %v1614_v10 = vmax.f32 %v1612_v26, %v1613_v28  ;;  %2839 = vpow2.f32 %v1917_v21 }
 0x4f4   : > { %2841 = vpow2.f32 %v1919_v54 }
 0x4f5   : > { %v1615_v39 = vrot.slane %v1614_v10, 1  ;;  %2843 = vpow2.f32 %v1921_v17 }
 0x4f6   : > { %2845 = vpow2.f32 %v1923_v49 }
 0x4f7   : > { %v3729_v30 = vpop.eup %2821  ;;  %v3739_v43 = vmax.f32 %v1614_v10, %v1615_v39 }
 0x4f8   : > { %v3733_v20 = vpop.eup %2823 }
 0x4f9   : > { %v1931_v52 = vadd.f32 %v3733_v20, %v3729_v30  ;;  %v3741_v32 = vpop.eup %2825  ;;  %v1617_v7 = vsub.f32 %v3617_v41, %v3739_v43  ;;  %v1618_v45 = vsub.f32 %v3621_v22, %v3739_v43  ;;  %v1619_v55 = vsub.f32 %v3615_v5, %v3739_v43 }
 0x4fa   : > { %v3748_v33 = vpop.eup %2827  ;;  %v1898_v41 = vsub.f32 %v3650_v24, %v3677_v18  ;;  %v1620_v46 = vsub.f32 %v3619_v31, %v3739_v43  ;;  %v1621_v35 = vsub.f32 %v3627_v2, %v3739_v43  ;;  %v1622_v31 = vsub.f32 %v3653_v27, %v3739_v43 }
 0x4fb   : > { %v1932_v16 = vadd.f32 %v3741_v32, %v1931_v52  ;;  %v3757_v40 = vpop.eup %2829  ;;  %v1633_v23 = vmul.f32 1.442695, %v1617_v7  ;;  %v1635_v25 = vmul.f32 1.442695, %v1618_v45  ;;  %v1637_v60 = vmul.f32 1.442695, %v1619_v55 }
 0x4fc   : > { %v3764_v5 = vpop.eup %2831  ;;  %v1639_v18 = vmul.f32 1.442695, %v1620_v46  ;;  %v1929_v38 = vmul.f32 1.442695, %v1898_v41  ;;  %v1623_v2 = vsub.f32 %v3623_v59, %v3739_v43  ;;  %v1641_v14 = vmul.f32 1.442695, %v1621_v35 }
 0x4fd   : > { %v1933_v4 = vadd.f32 %v3748_v33, %v1932_v16  ;;  %2847 = vpow2.f32 %v1633_v23  ;;  %v3769_v24 = vpop.eup %2833  ;;  %v1624_v27 = vsub.f32 %v3643_v61, %v3739_v43  ;;  %v1643_v58 = vmul.f32 1.442695, %v1622_v31 }
 0x4fe   : > { %2849 = vpow2.f32 %v1635_v25  ;;  %v3774_v34 = vpop.eup %2835  ;;  %v1625_v59 = vsub.f32 %v3665_v13, %v3739_v43  ;;  %v1645_v29 = vmul.f32 1.442695, %v1623_v2  ;;  %v1626_v21 = vsub.f32 %v3663_v3, %v3739_v43 }
 0x4ff   : > { %v1934_v22 = vadd.f32 %v3757_v40, %v1933_v4  ;;  %2851 = vpow2.f32 %v1925_v37  ;;  %v3779_v47 = vpop.eup %2837  ;;  %v1647_v61 = vmul.f32 1.442695, %v1624_v27  ;;  %v1627_v54 = vsub.f32 %v3679_v15, %v3739_v43 }
 0x500   : > { %2853 = vpow2.f32 %v1637_v60  ;;  %v3784_v19 = vpop.eup %2839  ;;  %v1649_v13 = vmul.f32 1.442695, %v1625_v59  ;;  %v1628_v3 = vsub.f32 %v3669_v56, %v3739_v43  ;;  %v1651_v16 = vmul.f32 1.442695, %v1626_v21 }
 0x501   : > { %v1935_v8 = vadd.f32 %v3764_v5, %v1934_v22  ;;  %2855 = vpow2.f32 %v1927_v62  ;;  %v3789_v53 = vpop.eup %2841  ;;  %v1629_v15 = vsub.f32 %v3682_v50, %v3739_v43  ;;  %v1653_v55 = vmul.f32 1.442695, %v1627_v54 }
 0x502   : > { %2857 = vpow2.f32 %v1639_v18  ;;  %v3794_v51 = vpop.eup %2843  ;;  %v1630_v46 = vsub.f32 %v3671_v48, %v3739_v43  ;;  %v1655_v37 = vmul.f32 1.442695, %v1628_v3  ;;  %v1631_v25 = vsub.f32 %v3694_v42, %v3739_v43 }
 0x503   : > { %v1936_v0 = vadd.f32 %v3769_v24, %v1935_v8  ;;  %2859 = vpow2.f32 %v1929_v38  ;;  %v3798_v52 = vpop.eup %2845  ;;  %v1657_v60 = vmul.f32 1.442695, %v1629_v15  ;;  %v1632_v48 = vsub.f32 %v3684_v36, %v3739_v43 }
 0x504   : > { %2861 = vpow2.f32 %v1641_v14  ;;  %v1659_v18 = vmul.f32 1.442695, %v1630_v46  ;;  %v1661_v14 = vmul.f32 1.442695, %v1631_v25 }
 0x505   : > { %v1937_v26 = vadd.f32 %v3774_v34, %v1936_v0  ;;  %2863 = vpow2.f32 %v1643_v58  ;;  %v1663_v58 = vmul.f32 1.442695, %v1632_v48 }
 0x506   : > { %2865 = vpow2.f32 %v1645_v29 }
 0x507   : > { %v1938_v28 = vadd.f32 %v3779_v47, %v1937_v26  ;;  %2867 = vpow2.f32 %v1647_v61 }
 0x508   : > { %2869 = vpow2.f32 %v1649_v13 }
 0x509   : > { %v1939_v10 = vadd.f32 %v3784_v19, %v1938_v28  ;;  %2871 = vpow2.f32 %v1651_v16 }
 0x50a   : > { %v3801_v17 = vpop.eup %2847  ;;  %2873 = vpow2.f32 %v1653_v55 }
 0x50b   : > { %v1940_v39 = vadd.f32 %v3789_v53, %v1939_v10  ;;  %v3805_v7 = vpop.eup %2849  ;;  %2875 = vpow2.f32 %v1655_v37 }
 0x50c   : > { %v3808_v45 = vpop.eup %2851  ;;  %v1665_v11 = vadd.f32 %v3805_v7, %v3801_v17  ;;  %2877 = vpow2.f32 %v1657_v60 }
 0x50d   : > { %v1941_v44 = vadd.f32 %v3794_v51, %v1940_v39  ;;  %v3814_v4 = vpop.eup %2853  ;;  %2879 = vpow2.f32 %v1659_v18 }
 0x50e   : > { %v2856_v41 = vpop.eup %2855  ;;  %v1666_v22 = vadd.f32 %v3814_v4, %v1665_v11  ;;  %2881 = vpow2.f32 %v1661_v14 }
 0x50f   : > { %v1942_v49 = vadd.f32 %v3798_v52, %v1941_v44  ;;  %v3820_v23 = vpop.eup %2857  ;;  %2883 = vpow2.f32 %v1663_v58 }
 0x510   : > { %v2860_v35 = vpop.eup %2859  ;;  %v1667_v62 = vadd.f32 %v3820_v23, %v1666_v22  ;;  %v1956_v22 = vpop.permute.xlu1 %1955 }
 0x511   : > { %v1943_v56 = vadd.f32 %v3808_v45, %v1942_v49  ;;  %v3825_v8 = vpop.eup %2861  ;;  %v1961_v60 = vrot.slane %v1956_v22, %v3514_v63 }
 0x512   : > { %v1668_v38 = vadd.f32 %v3825_v8, %v1667_v62  ;;  %v3830_v0 = vpop.eup %2863 }
 0x513   : > { %v1944_v50 = vadd.f32 %v2856_v41, %v1943_v56  ;;  %v3833_v26 = vpop.eup %2865 }
 0x514   : > { %v1669_v42 = vadd.f32 %v3830_v0, %v1668_v38  ;;  %v3836_v59 = vpop.eup %2867 }
 0x515   : > { %v1945_v31 = vadd.f32 %v2860_v35, %v1944_v50  ;;  %v3839_v29 = vpop.eup %2869 }
 0x516   : > { %v1670_v28 = vadd.f32 %v3833_v26, %v1669_v42  ;;  %v3842_v61 = vpop.eup %2871 }
 0x517   : > { %v1946_v2 = vrot.slane %v1945_v31, 4  ;;  %v3845_v13 = vpop.eup %2873 }
 0x518   : > { %v1671_v43 = vadd.f32 %v3836_v59, %v1670_v28  ;;  %v3848_v16 = vpop.eup %2875 }
 0x519   : > { %v1947_v27 = vadd.f32 %v1946_v2, %v1945_v31  ;;  %v2878_v15 = vpop.eup %2877 }
 0x51a   : > { %v1672_v21 = vadd.f32 %v3839_v29, %v1671_v43  ;;  %v2880_v11 = vpop.eup %2879 }
 0x51b   : > { %v1948_v36 = vrot.slane %v1947_v27, 2  ;;  %v2882_v46 = vpop.eup %2881 }
 0x51c   : > { %v1673_v54 = vadd.f32 %v3842_v61, %v1672_v21  ;;  %v2884_v50 = vpop.eup %2883 }
 0x51d   : > { %v1949_v10 = vadd.f32 %v1948_v36, %v1947_v27 }
 0x51e   : > { %v1674_v3 = vadd.f32 %v3845_v13, %v1673_v54 }
 0x51f   : > { %v1950_v39 = vrot.slane %v1949_v10, 1 }
 0x520   : > { %v1675_v49 = vadd.f32 %v3848_v16, %v1674_v3 }
 0x521   : > { %v1951_v44 = vadd.f32 %v1950_v39, %v1949_v10 }
 0x522   : > { %v1676_v55 = vadd.f32 %v2878_v15, %v1675_v49 }
 0x523   : > { %2885 = vrcp.f32 %v1951_v44 }
 0x524   : > { %v1677_v56 = vadd.f32 %v2880_v11, %v1676_v55 }
 0x526   : > { %v1678_v37 = vadd.f32 %v2882_v46, %v1677_v56 }
 0x528   : > { %v1679_v25 = vadd.f32 %v2884_v50, %v1678_v37 }
 0x52a   : > { %v1680_v62 = vrot.slane %v1679_v25, 4 }
 0x52c   : > { %v1681_v48 = vadd.f32 %v1680_v62, %v1679_v25 }
 0x52e   : > { %v1682_v38 = vrot.slane %v1681_v48, 2 }
 0x530   : > { %v2886_v31 = vpop.eup %2885  ;;  %v1683_v42 = vadd.f32 %v1682_v38, %v1681_v48 }
 0x531   : > { %v1962_v18 = vmul.f32 %v2886_v31, %v1961_v60 }
 0x532   : > { %v1684_v21 = vrot.slane %v1683_v42, 1 }
 0x533   : > { %v1977_v2 = vmul.f32 %v2856_v41, %v1962_v18  ;;  %v1978_v14 = vmul.f32 %v2860_v35, %v1962_v18  ;;  %v1975_v27 = vmul.f32 %v3798_v52, %v1962_v18  ;;  %v1971_v58 = vmul.f32 %v3779_v47, %v1962_v18 }
 0x534   : > { %v1976_v36 = vmul.f32 %v3808_v45, %v1962_v18  ;;  %v1972_v43 = vmul.f32 %v3784_v19, %v1962_v18  ;;  %v1969_v10 = vmul.f32 %v3769_v24, %v1962_v18  ;;  %v1973_v39 = vmul.f32 %v3789_v53, %v1962_v18 }
 0x535   : > { %v1986_v28 = vpack.c.bf16 %v1978_v14, %v1977_v2  ;;  %v1970_v54 = vmul.f32 %v3774_v34, %v1962_v18  ;;  %v1967_v41 = vmul.f32 %v3757_v40, %v1962_v18  ;;  %v1968_v52 = vmul.f32 %v3764_v5, %v1962_v18 }
 0x536   : > { %v1983_v35 = vpack.c.bf16 %v1972_v43, %v1971_v58  ;;  %v1965_v47 = vmul.f32 %v3741_v32, %v1962_v18  ;;  %v1966_v44 = vmul.f32 %v3748_v33, %v1962_v18  ;;  %v1685_v45 = vadd.f32 %v1684_v21, %v1683_v42  ;;  %v1690_v33 = vpop.permute.xlu0 %1689 }
 0x537   : > { %2613 = vmatpush3.bf16.msra.mxu1 %v1986_v28  ;;  %v1982_v19 = vpack.c.bf16 %v1970_v54, %v1969_v10  ;;  %v1963_v24 = vmul.f32 %v3729_v30, %v1962_v18  ;;  %v1964_v53 = vmul.f32 %v3733_v20, %v1962_v18  ;;  %v1985_v3 = vpack.c.bf16 %v1976_v36, %v1975_v27 }
 0x538   : > { %2614 = vmatprep.subr.bf16.mxu1 %v2953_v1  ;;  %v1974_v34 = vmul.f32 %v3794_v51, %v1962_v18  ;;  %v1981_v40 = vpack.c.bf16 %v1968_v52, %v1967_v41  ;;  %v1980_v49 = vpack.c.bf16 %v1966_v44, %v1965_v47  ;;  %2887 = vrcp.f32 %v1685_v45 }
 0x539   : > { %v1979_v55 = vpack.c.bf16 %v1964_v53, %v1963_v24  ;;  %v1695_v30 = vrot.slane %v1690_v33, %v3514_v63 }
 0x53a   : > { %v1984_v32 = vpack.c.bf16 %v1974_v34, %v1973_v39 }
 0x53b   : > { %2615 = vmatpush3.bf16.msra.mxu1 %v1985_v3 }
 0x53c   : > { %2616 = vmatprep.subr.bf16.mxu1 %v2953_v1 }
 0x53f   : > { %2617 = vmatpush3.bf16.msra.mxu1 %v1984_v32  ;;  %v2889_v32 = vld [vmem:[%s3092_s25] sm:$0xff] }
 0x540   : > { %2618 = vmatprep.subr.bf16.mxu1 %v2953_v1 }
 0x543   : > { %2619 = vmatpush3.bf16.msra.mxu1 %v1983_v35 }
 0x544   : > { %2620 = vmatprep.subr.bf16.mxu1 %v2953_v1 }
 0x545   : > { %v2888_v20 = vpop.eup %2887 }
 0x546   : > { %v1696_v5 = vmul.f32 %v2888_v20, %v1695_v30 }
 0x547   : > { %2621 = vmatpush3.bf16.msra.mxu1 %v1982_v19 }
 0x548   : > { %2622 = vmatprep.subr.bf16.mxu1 %v2953_v1  ;;  %v1711_v51 = vmul.f32 %v2882_v46, %v1696_v5  ;;  %v1712_v56 = vmul.f32 %v2884_v50, %v1696_v5  ;;  %v1709_v37 = vmul.f32 %v2878_v15, %v1696_v5  ;;  %v1705_v22 = vmul.f32 %v3839_v29, %v1696_v5 }
 0x549   : > { %v1706_v25 = vmul.f32 %v3842_v61, %v1696_v5  ;;  %v1710_v62 = vmul.f32 %v2880_v11, %v1696_v5  ;;  %v1703_v31 = vmul.f32 %v3833_v26, %v1696_v5  ;;  %v1704_v63 = vmul.f32 %v3836_v59, %v1696_v5  ;;  %v780_v59 = vld [vmem:[#allocation3 + $0x18] sm:$0xff]  ;;  %v781_v11 = vld [vmem:[#allocation3 + $0x8] sm:$0xff] }
 0x54a   : > { %v1720_v60 = vpack.c.bf16 %v1712_v56, %v1711_v51  ;;  %v1701_v18 = vmul.f32 %v3825_v8, %v1696_v5  ;;  %v1702_v46 = vmul.f32 %v3830_v0, %v1696_v5  ;;  %v1699_v29 = vmul.f32 %v3814_v4, %v1696_v5 }
 0x54b   : > { %2623 = vmatpush3.bf16.msra.mxu1 %v1981_v40  ;;  %v1717_v48 = vpack.c.bf16 %v1706_v25, %v1705_v22  ;;  %v1716_v15 = vpack.c.bf16 %v1704_v63, %v1703_v31  ;;  %v1700_v61 = vmul.f32 %v3820_v23, %v1696_v5  ;;  %v1697_v50 = vmul.f32 %v3801_v17, %v1696_v5 }
 0x54c   : > { %2624 = vmatprep.subr.bf16.mxu1 %v2953_v1  ;;  %2633 = vmatpush3.bf16.msra.mxu0 %v1720_v60  ;;  %v1715_v26 = vpack.c.bf16 %v1702_v46, %v1701_v18  ;;  %v1698_v38 = vmul.f32 %v3805_v7, %v1696_v5  ;;  %v1719_v2 = vpack.c.bf16 %v1710_v62, %v1709_v37  ;;  %v2162_v7 = vld [vmem:[%s3959_s8 + $0x8] sm:$0xff] }
 0x54d   : > { %2634 = vmatprep.subr.bf16.mxu0 %v2953_v1  ;;  %v1707_v8 = vmul.f32 %v3845_v13, %v1696_v5  ;;  %v1708_v0 = vmul.f32 %v3848_v16, %v1696_v5  ;;  %v1714_v4 = vpack.c.bf16 %v1700_v61, %v1699_v29  ;;  %v1454_v23 = vpack.c.bf16 %v781_v11, %v780_v59  ;;  %v2161_v13 = vld [vmem:[%s3959_s8] sm:$0xff]  ;;  %v2890_v5 = vld [vmem:[%s3092_s25 + $0x8] sm:$0xff] }
 0x54e   : > { %v1713_v14 = vpack.c.bf16 %v1698_v38, %v1697_v50  ;;  %2170 = vperm.xlu1 %2750, %v2162_v7   ;;  %2165 = vperm.xlu0 %2749, %v2161_v13  }
 0x54f   : > { %2625 = vmatpush3.bf16.msra.mxu1 %v1980_v49  ;;  %v1718_v17 = vpack.c.bf16 %v1708_v0, %v1707_v8 }
 0x550   : > { %2626 = vmatprep.subr.bf16.mxu1 %v2953_v1  ;;  %2635 = vmatpush3.bf16.msra.mxu0 %v1719_v2 }
 0x551   : > { %2636 = vmatprep.subr.bf16.mxu0 %v2953_v1 }
 0x552   : > { %2179 = vperm.xlu1 %2750, %v2175_v57  }
 0x553   : > { %2627 = vmatpush3.bf16.msra.mxu1 %v1979_v55 }
 0x554   : > { %2652 = vmatprep.subr.bf16.mxu1 %v2953_v1  ;;  %2637 = vmatpush3.bf16.msra.mxu0 %v1718_v17 }
 0x555   : > { %2638 = vmatprep.subr.bf16.mxu0 %v2953_v1 }
 0x556   : > { %2629 = vmatmul.mubr.bf16.vlgmr.msra.gmra.mxu1 %v1454_v23 }
 0x557   : > { %2654 = vmatprep.mubr.msk.bf16.mxu1 %vm2954_vm5, %v2953_v1 }
 0x558   : > { %2639 = vmatpush3.bf16.msra.mxu0 %v1717_v48 }
 0x559   : > { %2640 = vmatprep.subr.bf16.mxu0 %v2953_v1 }
 0x55c   : > { %2641 = vmatpush3.bf16.msra.mxu0 %v1716_v15 }
 0x55d   : > { %2642 = vmatprep.subr.bf16.mxu0 %v2953_v1 }
 0x55e   : > { %v2072_v39 = vpop.permute.xlu1 %2071 }
 0x560   : > { %2643 = vmatpush3.bf16.msra.mxu0 %v1715_v26 }
 0x561   : > { %2644 = vmatprep.subr.bf16.mxu0 %v2953_v1 }
 0x564   : > { %2645 = vmatpush3.bf16.msra.mxu0 %v1714_v4 }
 0x565   : > { %2646 = vmatprep.subr.bf16.mxu0 %v2953_v1 }
 0x568   : > { %2647 = vmatpush3.bf16.msra.mxu0 %v1713_v14 }
 0x569   : > { %2658 = vmatprep.subr.bf16.mxu0 %v2953_v1 }
 0x56b   : > { %2649 = vmatmul.mubr.bf16.vlgmr.msra.gmra.mxu0 %v1454_v23 }
 0x56c   : > { %2659 = vmatpush3.bf16.msra.mxu0 %v1453_v12  ;;  %2660 = vmatprep.mubr.msk.bf16.mxu0 %vm2954_vm5, %v2953_v1  ;;  %v2176_v1 = vld [vmem:[%s3960_s9 + $0x8] sm:$0xff] }
 0x56d   : > { %2184 = vperm.xlu0 %2749, %v2176_v1  }
 0x573   : > { %2661 = vmatmul.mubr.msk.bf16.vlgmr.msra.gmra.mxu0 %vm706_vm2, %v3719_v9 }
 0x5c9   : > { %v2171_v52 = vpop.permute.xlu1 %2170  ;;  %v2166_v45 = vpop.permute.xlu0 %2165 }
 0x5cd   : > { %v2180_v24 = vpop.permute.xlu1 %2179 }
 0x5e8   : > { %v2185_v30 = vpop.permute.xlu0 %2184 }
 0x616   : > { %v2021_v6 = vpop.f32.mrf.mxu1 }
 0x618   : > { %v2630_v12 = vpop.f32.mrf.mxu1 }
 0x61a   : > { %v2024_v9 = vpop.f32.mrf.mxu1 }
 0x61c   : > { %v2631_v16 = vpop.f32.mrf.mxu1 }
 0x62b   : > { %v2062_v42 = vpop.f32.mrf.mxu0 }
 0x62c   : > { %v2063_v28 = vadd.f32 %v2062_v42, %v2021_v6 }
 0x62d   : > { %v2650_v27 = vpop.f32.mrf.mxu0 }
 0x62f   : > { %v2065_v58 = vpop.f32.mrf.mxu0 }
 0x630   : > { %v2066_v36 = vadd.f32 %v2065_v58, %v2024_v9 }
 0x631   : > { %v2651_v43 = vpop.f32.mrf.mxu0 }
 0x632   : > { %v2069_v10 = vpack.c.bf16 %v2066_v36, %v2063_v28 }
 0x633   : > { %v2154_v21 = vpop.f32.mrf.mxu0 }
 0x634   : > { %2653 = vmatpush3.bf16.msra.mxu1 %v2069_v10 }
 0x635   : > { %v2662_v54 = vpop.f32.mrf.mxu0 }
 0x637   : > { %2655 = vmatmul.mubr.msk.bf16.vlgmr.msra.gmra.mxu1 %vm706_vm2, %v2072_v39  ;;  %v2157_v41 = vpop.f32.mrf.mxu0 }
 0x639   : > { %v2663_v35 = vpop.f32.mrf.mxu0 }
 0x6f7   : > { %v2110_v47 = vpop.f32.mrf.mxu1 }
 0x6f8   : > { %v2155_v44 = vadd.f32 %v2154_v21, %v2110_v47 }
 0x6f9   : > { %v2656_v19 = vpop.f32.mrf.mxu1 }
 0x6fa   : > { %v2173_v53 = vmul.f32 %v2166_v45, %v2155_v44 }
 0x6fb   : > { %v2113_v3 = vpop.f32.mrf.mxu1 }
 0x6fc   : > { %v2158_v34 = vadd.f32 %v2157_v41, %v2113_v3  ;;  %v2187_v40 = vadd.f32 %v2180_v24, %v2173_v53 }
 0x6fd   : > { %v2657_v49 = vpop.f32.mrf.mxu1 }
 0x6fe   : > { %v2174_v55 = vmul.f32 %v2171_v52, %v2158_v34  ;;  %v2189_v33 = vadd.f32 %v2889_v32, %v2187_v40 }
 0x700   : > { %2191 = vst [vmem:[%s3094_s0] sm:$0xff] %v2189_v33  ;;  %v2188_v20 = vadd.f32 %v2185_v30, %v2174_v55  ;;  %2199 = sbr.rel (!%p3060_p6) target bundleno = 1805 (0x70d), region = 106 }
 0x702   : > { %v2190_v51 = vadd.f32 %v2890_v5, %v2188_v20 }
 0x704   : > { %2192 = vst [vmem:[%s3094_s0 + $0x8] sm:$0xff] %v2190_v51 }
 0x707   : > { %v2234_v56 = vld [vmem:[%s3094_s0] sm:$0xff] }
 0x708   : > { %2235 = vst [vmem:[%s2203_s23] sm:$0xff] %v2234_v56 }
 0x70b   : > { %v2236_v37 = vld [vmem:[%s3094_s0 + $0x8] sm:$0xff] }
 0x70c   : > { %2237 = vst [vmem:[%s2203_s23 + $0x10] sm:$0xff] %v2236_v37 }
 0x70d PF: > { %s20_s19 = sadd.s32 1, %s2945_s19   ;;  %s3970_s24 = sld [smem:[#allocation6_spill]] }
 0x70e   : > { %p17_p0 = scmp.ge.s32.totalorder %s20_s19, 6   ;;  %s3971_s13 = smov %s2925_s14 }
 0x70f   : > { %s3972_s14 = smov %s3068_s28  ;;  %s3973_s15 = smov %s2937_s17 }
 0x710   : > { %s3974_s16 = smov %s2941_s18  ;;  %s3976_s18 = smov %s3982_s21 }
 0x711   :  { %19 = sbr.rel (!%p17_p0) target bundleno = 7 (0x7), region = 181 }
 0x713   : > { %s3975_s17 = smov %s3970_s24 }

</bundles_post_ra>
